<compile_context>
chip_gen: v5e
topology: v5e:2x2
jax: 0.10.0
libtpu: 0.0.40
codegen_flags: <defaults>
</compile_context>

<pallas_src>
import jax
import jax.numpy as jnp
from jax.experimental import pallas as pl
from jax.experimental.pallas import tpu as pltpu

KERNEL_SIZES = (2, 3, 4, 5)
CHANNEL_OUT = 10
CHARACTER_SIZE = 251

VOCAB_PAD = 256                       # 251 -> 256 lanes (2 x 128) for the one-hot LHS
NUM_TAPS = max(KERNEL_SIZES)          # 5 conv taps
TAP_BLOCK = 128                       # each tap owns its own 128-lane-aligned block
GROUP_STRIDE = 32                     # lane offset of each kernel-size group in a tap block
FUSED_COLS = NUM_TAPS * TAP_BLOCK     # 640 fused RHS columns
HEAD_PAD = 128                        # padded width of the MLP head
TARGET_ROWS = 2048                    # target fused-matmul rows (TB*L) per grid step


# --------------------------------------------------------------------------- #
# Kernel
# --------------------------------------------------------------------------- #
def regression_kernel(tok_ref, fhi_ref, flo_ref, kmap_ref, cb_ref,
                      w1_ref, b1_ref, w2_ref, b2_ref, out_ref, conv_acc_ref):
    # tok_ref  : (TB*L, 1) int32   flattened token ids for this batch tile
    # fhi_ref  : (256, 640) bf16   hi part of embedding @ tap-major conv weights
    # flo_ref  : (256, 640) bf16   lo (residual) part of the same
    # kmap_ref : (1, 128) int32    conv kernel size k per output lane
    # cb_ref   : (1, 128) f32      conv biases packed at the same lanes
    # w1_ref   : (128, 128) f32    linear1 packed (rows = pooled lanes, cols 0..9 live)
    # b1_ref   : (1, 128) f32      linear1 bias (cols 0..9 live)
    # w2_ref   : (128, 1) f32      linear2 weight (rows 0..9 live)
    # b2_ref   : (1, 1) f32        linear2 bias
    # out_ref  : (TB, 1) f32
    # conv_acc_ref : (TB*L, 128) f32 VMEM scratch for the shifted-add conv sum
    m = tok_ref.shape[0]              # TB * L
    tb = out_ref.shape[0]             # batch rows in this grid step
    seq = m // tb                     # L
    vpad = fhi_ref.shape[0]           # 256

    # One-hot tokens built directly in bf16 (exact 0/1 values, no f32 cast).
    tok = tok_ref[...]                                                  # (M, 1)
    onehot = (jax.lax.broadcasted_iota(jnp.int32, (m, vpad), 1) == tok
              ).astype(jnp.bfloat16)                                    # (M, 256)

    # Fused embedding-gather + all conv taps as two EXACT bf16 gather matmuls
    # (hi + lo split of the f32 fused weights), accumulated in f32.
    y = jnp.dot(onehot, fhi_ref[...], preferred_element_type=jnp.float32)
    y = y + jnp.dot(onehot, flo_ref[...], preferred_element_type=jnp.float32)
    # y[m, d*128 + lane] = tap-d contribution at flat position m (lane-aligned).

    # Conv over time = 4 time-shifted adds of 128-lane-aligned tap blocks.
    # Rows whose shifted index runs past the valid range only affect invalid
    # time positions, which the masked max below discards (columns with
    # d >= k are zero by construction, so they never contribute garbage).
    conv_acc_ref[...] = y[:, 0:TAP_BLOCK]
    for d in range(1, NUM_TAPS):
        conv_acc_ref[0:m - d, :] = (
            conv_acc_ref[0:m - d, :]
            + y[d:m, d * TAP_BLOCK:(d + 1) * TAP_BLOCK])
    s3 = conv_acc_ref[...].reshape(tb, seq, TAP_BLOCK)                  # (TB, L, 128)

    # Masked max over time FIRST (valid t <= L - k(lane)), then bias + ReLU
    # (bias is constant over t and ReLU is monotone, so this is exact).
    thr = (seq - kmap_ref[...]).reshape(1, 1, TAP_BLOCK)                # L - k per lane
    t_idx = jax.lax.broadcasted_iota(jnp.int32, (tb, seq, TAP_BLOCK), 1)
    pooled = jnp.max(jnp.where(t_idx <= thr, s3, -jnp.inf), axis=1)     # (TB, 128)
    act = jnp.maximum(pooled + cb_ref[...], 0.0)

    # MLP head: ONE packed (128 -> 128) matmul (cols 0..9 live) + final proj.
    h = jnp.maximum(
        jnp.dot(act, w1_ref[...], preferred_element_type=jnp.float32) + b1_ref[...],
        0.0)
    # TODO(synk): dropout is identity (eval mode); training-mode dropout is not implemented.
    out_ref[...] = (jnp.dot(h, w2_ref[...], preferred_element_type=jnp.float32)
                    + b2_ref[...])


# --------------------------------------------------------------------------- #
# Parameter construction (torch-like layouts)
# --------------------------------------------------------------------------- #
def init_params(key, embedding_dim):
    """conv{k}_w matches Conv2d weight (C_out, 1, k, E).squeeze(1)."""
    ks = jax.random.split(key, 16)
    params = {
        "embedding": 0.1 * jax.random.normal(
            ks[0], (CHARACTER_SIZE, embedding_dim), jnp.float32),
        "lin1_w": 0.1 * jax.random.normal(
            ks[1], (10, CHANNEL_OUT * len(KERNEL_SIZES)), jnp.float32),
        "lin1_b": 0.1 * jax.random.normal(ks[2], (10,), jnp.float32),
        "lin2_w": 0.1 * jax.random.normal(ks[3], (1, 10), jnp.float32),
        "lin2_b": 0.1 * jax.random.normal(ks[4], (1,), jnp.float32),
    }
    for i, k in enumerate(KERNEL_SIZES):
        params[f"conv{k}_w"] = 0.1 * jax.random.normal(
            ks[5 + 2 * i], (CHANNEL_OUT, k, embedding_dim), jnp.float32)
        params[f"conv{k}_b"] = 0.1 * jax.random.normal(
            ks[6 + 2 * i], (CHANNEL_OUT,), jnp.float32)
    return params


def _pack_weights(params):
    """Host-side weight preprocessing (layout + folding only, no per-token work)."""
    emb = params["embedding"].astype(jnp.float32)                      # (251, E)

    # Tap-major fused weights: tap d lives in lanes [d*128, (d+1)*128), kernel
    # group kk (k = KERNEL_SIZES[kk]) at lanes [kk*32, kk*32+10) inside each
    # block; columns with d >= k stay zero.  Embedding table is folded in
    # (conv over E is linear): gather+conv == one_hot(tok) @ (emb @ W).
    fused = jnp.zeros((VOCAB_PAD, FUSED_COLS), jnp.float32)
    for kk, k in enumerate(KERNEL_SIZES):
        w = params[f"conv{k}_w"].astype(jnp.float32)                   # (10, k, E)
        for d in range(k):
            col0 = d * TAP_BLOCK + kk * GROUP_STRIDE
            fused = fused.at[:CHARACTER_SIZE, col0:col0 + CHANNEL_OUT].set(
                emb @ w[:, d, :].T)                                    # (251, 10)
    f_hi = fused.astype(jnp.bfloat16)
    f_lo = (fused - f_hi.astype(jnp.float32)).astype(jnp.bfloat16)

    kmap = jnp.zeros((1, TAP_BLOCK), jnp.int32)
    conv_b = jnp.zeros((1, TAP_BLOCK), jnp.float32)
    for kk, k in enumerate(KERNEL_SIZES):
        g0 = kk * GROUP_STRIDE
        kmap = kmap.at[0, g0:g0 + GROUP_STRIDE].set(k)
        conv_b = conv_b.at[0, g0:g0 + CHANNEL_OUT].set(params[f"conv{k}_b"])

    lin1_w = params["lin1_w"].astype(jnp.float32)                      # (10, 40)
    w1 = jnp.zeros((TAP_BLOCK, HEAD_PAD), jnp.float32)
    for kk in range(len(KERNEL_SIZES)):
        g0 = kk * GROUP_STRIDE
        w1 = w1.at[g0:g0 + CHANNEL_OUT, :10].set(
            lin1_w[:, kk * CHANNEL_OUT:(kk + 1) * CHANNEL_OUT].T)      # (10, 10)
    b1 = jnp.zeros((1, HEAD_PAD), jnp.float32).at[0, :10].set(params["lin1_b"])
    w2 = jnp.zeros((HEAD_PAD, 1), jnp.float32).at[:10, 0].set(params["lin2_w"][0])
    b2 = params["lin2_b"].reshape(1, 1).astype(jnp.float32)
    return f_hi, f_lo, kmap, conv_b, w1, b1, w2, b2


# --------------------------------------------------------------------------- #
# Wrapper
# --------------------------------------------------------------------------- #
def regression_forward(tokens, params, *, block_batch=None):
    B, L = tokens.shape
    assert L >= max(KERNEL_SIZES), (
        "max_length must be >= the largest conv kernel size (5)")
    # NOTE: L % 8 == 0 keeps every per-batch-row sublane tile aligned; other
    # lengths are correct but pay extra relayout cost.

    f_hi, f_lo, kmap, conv_b, w1, b1, w2, b2 = _pack_weights(params)

    if block_batch is None:
        # ~2048 fused-matmul rows per grid step amortizes the ~0.35us per-step
        # overhead and the head weight pushes; per-step intermediates are
        # ~M*3 KiB so this stays far below the v7x 64 MiB VMEM (v5e/v6e have
        # more).  Assumes L <~ 512; tune block_batch manually beyond that.
        tb = max(1, TARGET_ROWS // L)
        block_batch = max(8, ((tb + 7) // 8) * 8)
        # v7x megacore: prefer >= 2 grid steps when the batch is big enough so
        # the "parallel" batch axis can split across both TensorCores.
        if 16 < B <= block_batch:
            block_batch = max(8, (((B + 1) // 2 + 7) // 8) * 8)

    if B <= block_batch:
        TB, Bp = B, B
    else:
        TB = block_batch
        Bp = pl.cdiv(B, TB) * TB
    if Bp != B:
        tokens = jnp.concatenate(
            [tokens, jnp.zeros((Bp - B, L), tokens.dtype)], axis=0)
    num_blocks = Bp // TB
    tok_flat = tokens.reshape(Bp * L, 1).astype(jnp.int32)
    m_blk = TB * L

    flops = (2 * 2 * Bp * L * VOCAB_PAD * FUSED_COLS        # hi + lo gather matmuls
             + 2 * Bp * TAP_BLOCK * HEAD_PAD                # linear1
             + 2 * Bp * HEAD_PAD)                           # linear2
    bytes_accessed = (Bp * L * 4                            # tokens
                      + 2 * VOCAB_PAD * FUSED_COLS * 2      # fused hi/lo weights
                      + (HEAD_PAD * HEAD_PAD + 4 * HEAD_PAD + 1) * 4
                      + Bp * 4)                             # output

    out = pl.pallas_call(
        regression_kernel,
        out_shape=jax.ShapeDtypeStruct((Bp, 1), jnp.float32),
        grid=(num_blocks,),
        in_specs=[
            pl.BlockSpec((m_blk, 1), lambda i: (i, 0)),      # tokens (pipelined)
            pl.BlockSpec(f_hi.shape, lambda i: (0, 0)),      # VMEM-resident weights
            pl.BlockSpec(f_lo.shape, lambda i: (0, 0)),
            pl.BlockSpec(kmap.shape, lambda i: (0, 0)),
            pl.BlockSpec(conv_b.shape, lambda i: (0, 0)),
            pl.BlockSpec(w1.shape, lambda i: (0, 0)),
            pl.BlockSpec(b1.shape, lambda i: (0, 0)),
            pl.BlockSpec(w2.shape, lambda i: (0, 0)),
            pl.BlockSpec(b2.shape, lambda i: (0, 0)),
        ],
        out_specs=pl.BlockSpec((TB, 1), lambda i: (i, 0)),
        scratch_shapes=[pltpu.VMEM((m_blk, TAP_BLOCK), jnp.float32)],
        compiler_params=pltpu.CompilerParams(
            dimension_semantics=("parallel",),
            vmem_limit_bytes=48 * 1024 * 1024),
        cost_estimate=pl.CostEstimate(
            flops=int(flops), transcendentals=0,
            bytes_accessed=int(bytes_accessed)),
    )(tok_flat, f_hi, f_lo, kmap, conv_b, w1, b1, w2, b2)
    return out[:B]


# --------------------------------------------------------------------------- #
# Pure-JAX reference (matches the PyTorch forward in eval mode)
# --------------------------------------------------------------------------- #
def regression_reference(tokens, params):
    emb = params["embedding"][tokens].astype(jnp.float32)              # (B, L, E)
    B, L, _ = emb.shape
    feats = []
    for k in KERNEL_SIZES:
        w = params[f"conv{k}_w"]                                       # (C, k, E)
        b = params[f"conv{k}_b"]                                       # (C,)
        T = L - k + 1
        acc = jnp.zeros((B, T, CHANNEL_OUT), jnp.float32)
        for dk in range(k):
            acc = acc + jnp.einsum("bte,ce->btc", emb[:, dk:dk + T, :], w[:, dk, :])
        acc = jnp.maximum(acc + b[None, None, :], 0.0)
        feats.append(jnp.max(acc, axis=1))
    feat = jnp.concatenate(feats, axis=1)                              # (B, 40)
    h = jnp.maximum(feat @ params["lin1_w"].T + params["lin1_b"][None, :], 0.0)
    return h @ params["lin2_w"].T + params["lin2_b"][None, :]


if __name__ == "__main__":
    embedding_dim = 32   # embedding_dim
    max_length = 16      # max_length
    batch = 2

    key = jax.random.PRNGKey(0)
    k_tok, k_par = jax.random.split(key)
    tokens = jax.random.randint(k_tok, (batch, max_length), 0, CHARACTER_SIZE,
                                dtype=jnp.int32)
    params = init_params(k_par, embedding_dim)

    out = regression_forward(tokens, params)
    jax.block_until_ready(out)
    assert out.shape == (batch, 1) and out.dtype == jnp.float32

    ref = regression_reference(tokens, params)
    assert jnp.allclose(out, ref, rtol=1e-3, atol=1e-3), (out, ref)
    print("KERNEL_OK")
</pallas_src>

<mosaic_0001>
module attributes {stable_mosaic.version = 11 : i64} {
  func.func @regression_kernel(%arg0: i32, %arg1: memref<32x1xi32, #tpu.memory_space<vmem>>, %arg2: memref<256x640xbf16, #tpu.memory_space<vmem>>, %arg3: memref<256x640xbf16, #tpu.memory_space<vmem>>, %arg4: memref<1x128xi32, #tpu.memory_space<vmem>>, %arg5: memref<1x128xf32, #tpu.memory_space<vmem>>, %arg6: memref<128x128xf32, #tpu.memory_space<vmem>>, %arg7: memref<1x128xf32, #tpu.memory_space<vmem>>, %arg8: memref<128x1xf32, #tpu.memory_space<vmem>>, %arg9: memref<1x1xf32, #tpu.memory_space<vmem>>, %arg10: memref<2x1xf32, #tpu.memory_space<vmem>>, %arg11: memref<32x128xf32, #tpu.memory_space<vmem>>) attributes {dimension_semantics = [#tpu.dimension_semantics<parallel>], iteration_bounds = array<i64: 1>, scalar_prefetch = 0 : i64, scratch_operands = 1 : i64, tpu.core_type = #tpu.core_type<tc>, window_params = [{transform_indices = @transform_0, window_bounds = array<i64: 32, 1>}, {pipeline_mode = #tpu.pipeline_mode<synchronous>, transform_indices = @transform_1, window_bounds = array<i64: 256, 640>}, {pipeline_mode = #tpu.pipeline_mode<synchronous>, transform_indices = @transform_2, window_bounds = array<i64: 256, 640>}, {pipeline_mode = #tpu.pipeline_mode<synchronous>, transform_indices = @transform_3, window_bounds = array<i64: 1, 128>}, {pipeline_mode = #tpu.pipeline_mode<synchronous>, transform_indices = @transform_4, window_bounds = array<i64: 1, 128>}, {pipeline_mode = #tpu.pipeline_mode<synchronous>, transform_indices = @transform_5, window_bounds = array<i64: 128, 128>}, {pipeline_mode = #tpu.pipeline_mode<synchronous>, transform_indices = @transform_6, window_bounds = array<i64: 1, 128>}, {pipeline_mode = #tpu.pipeline_mode<synchronous>, transform_indices = @transform_7, window_bounds = array<i64: 128, 1>}, {pipeline_mode = #tpu.pipeline_mode<synchronous>, transform_indices = @transform_8, window_bounds = array<i64: 1, 1>}, {transform_indices = @transform_9, window_bounds = array<i64: 2, 1>}]} {
    %c0 = arith.constant 0 : index
    %c0_0 = arith.constant 0 : index
    %0 = vector.load %arg1[%c0, %c0_0] : memref<32x1xi32, #tpu.memory_space<vmem>>, vector<32x1xi32>
    %1 = tpu.iota {dimensions = array<i32: 1>} : vector<32x256xi32>
    %2 = vector.broadcast %0 : vector<32x1xi32> to vector<32x256xi32>
    %3 = arith.cmpi eq, %1, %2 : vector<32x256xi32>
    %4 = arith.extui %3 : vector<32x256xi1> to vector<32x256xi32>
    %5 = arith.sitofp %4 : vector<32x256xi32> to vector<32x256xf32>
    %6 = arith.truncf %5 : vector<32x256xf32> to vector<32x256xbf16>
    %c0_1 = arith.constant 0 : index
    %c0_2 = arith.constant 0 : index
    %7 = vector.load %arg2[%c0_1, %c0_2] : memref<256x640xbf16, #tpu.memory_space<vmem>>, vector<256x640xbf16>
    %cst = arith.constant dense<0.000000e+00> : vector<32x640xf32>
    %8 = tpu.matmul %6, %7, %cst {dimension_numbers = #tpu.dot_dimension_numbers<[1], [0], [0], [1], [0, 0, 1, 1], [], []>} : vector<32x256xbf16>, vector<256x640xbf16>, vector<32x640xf32> -> vector<32x640xf32>
    %c0_3 = arith.constant 0 : index
    %c0_4 = arith.constant 0 : index
    %9 = vector.load %arg3[%c0_3, %c0_4] : memref<256x640xbf16, #tpu.memory_space<vmem>>, vector<256x640xbf16>
    %cst_5 = arith.constant dense<0.000000e+00> : vector<32x640xf32>
    %10 = tpu.matmul %6, %9, %cst_5 {dimension_numbers = #tpu.dot_dimension_numbers<[1], [0], [0], [1], [0, 0, 1, 1], [], []>} : vector<32x256xbf16>, vector<256x640xbf16>, vector<32x640xf32> -> vector<32x640xf32>
    %11 = arith.addf %8, %10 : vector<32x640xf32>
    %12 = vector.extract_strided_slice %11 {offsets = [0, 0], sizes = [32, 128], strides = [1, 1]} : vector<32x640xf32> to vector<32x128xf32>
    %c0_6 = arith.constant 0 : index
    %c0_7 = arith.constant 0 : index
    %13 = vector.load %arg11[%c0_6, %c0_7] : memref<32x128xf32, #tpu.memory_space<vmem>>, vector<32x128xf32>
    tpu.vector_store %arg11[%c0_6, %c0_7], %12 {strides = array<i32>} : memref<32x128xf32, #tpu.memory_space<vmem>>, vector<32x128xf32>,
    %c0_8 = arith.constant 0 : index
    %c0_9 = arith.constant 0 : index
    %14 = vector.load %arg11[%c0_8, %c0_9] : memref<32x128xf32, #tpu.memory_space<vmem>>, vector<31x128xf32>
    %15 = vector.extract_strided_slice %11 {offsets = [1, 128], sizes = [31, 128], strides = [1, 1]} : vector<32x640xf32> to vector<31x128xf32>
    %16 = arith.addf %14, %15 : vector<31x128xf32>
    %c0_10 = arith.constant 0 : index
    %c0_11 = arith.constant 0 : index
    %17 = vector.load %arg11[%c0_10, %c0_11] : memref<32x128xf32, #tpu.memory_space<vmem>>, vector<31x128xf32>
    tpu.vector_store %arg11[%c0_10, %c0_11], %16 {strides = array<i32>} : memref<32x128xf32, #tpu.memory_space<vmem>>, vector<31x128xf32>,
    %c0_12 = arith.constant 0 : index
    %c0_13 = arith.constant 0 : index
    %18 = vector.load %arg11[%c0_12, %c0_13] : memref<32x128xf32, #tpu.memory_space<vmem>>, vector<30x128xf32>
    %19 = vector.extract_strided_slice %11 {offsets = [2, 256], sizes = [30, 128], strides = [1, 1]} : vector<32x640xf32> to vector<30x128xf32>
    %20 = arith.addf %18, %19 : vector<30x128xf32>
    %c0_14 = arith.constant 0 : index
    %c0_15 = arith.constant 0 : index
    %21 = vector.load %arg11[%c0_14, %c0_15] : memref<32x128xf32, #tpu.memory_space<vmem>>, vector<30x128xf32>
    tpu.vector_store %arg11[%c0_14, %c0_15], %20 {strides = array<i32>} : memref<32x128xf32, #tpu.memory_space<vmem>>, vector<30x128xf32>,
    %c0_16 = arith.constant 0 : index
    %c0_17 = arith.constant 0 : index
    %22 = vector.load %arg11[%c0_16, %c0_17] : memref<32x128xf32, #tpu.memory_space<vmem>>, vector<29x128xf32>
    %23 = vector.extract_strided_slice %11 {offsets = [3, 384], sizes = [29, 128], strides = [1, 1]} : vector<32x640xf32> to vector<29x128xf32>
    %24 = arith.addf %22, %23 : vector<29x128xf32>
    %c0_18 = arith.constant 0 : index
    %c0_19 = arith.constant 0 : index
    %25 = vector.load %arg11[%c0_18, %c0_19] : memref<32x128xf32, #tpu.memory_space<vmem>>, vector<29x128xf32>
    tpu.vector_store %arg11[%c0_18, %c0_19], %24 {strides = array<i32>} : memref<32x128xf32, #tpu.memory_space<vmem>>, vector<29x128xf32>,
    %c0_20 = arith.constant 0 : index
    %c0_21 = arith.constant 0 : index
    %26 = vector.load %arg11[%c0_20, %c0_21] : memref<32x128xf32, #tpu.memory_space<vmem>>, vector<28x128xf32>
    %27 = vector.extract_strided_slice %11 {offsets = [4, 512], sizes = [28, 128], strides = [1, 1]} : vector<32x640xf32> to vector<28x128xf32>
    %28 = arith.addf %26, %27 : vector<28x128xf32>
    %c0_22 = arith.constant 0 : index
    %c0_23 = arith.constant 0 : index
    %29 = vector.load %arg11[%c0_22, %c0_23] : memref<32x128xf32, #tpu.memory_space<vmem>>, vector<28x128xf32>
    tpu.vector_store %arg11[%c0_22, %c0_23], %28 {strides = array<i32>} : memref<32x128xf32, #tpu.memory_space<vmem>>, vector<28x128xf32>,
    %c0_24 = arith.constant 0 : index
    %c0_25 = arith.constant 0 : index
    %30 = vector.load %arg11[%c0_24, %c0_25] : memref<32x128xf32, #tpu.memory_space<vmem>>, vector<32x128xf32>
    %31 = vector.shape_cast %30 : vector<32x128xf32> to vector<2x16x128xf32>
    %c0_26 = arith.constant 0 : index
    %c0_27 = arith.constant 0 : index
    %32 = vector.load %arg4[%c0_26, %c0_27] : memref<1x128xi32, #tpu.memory_space<vmem>>, vector<1x128xi32>
    %c16_i32 = arith.constant 16 : i32
    %33 = vector.broadcast %c16_i32 : i32 to vector<1x128xi32>
    %34 = arith.subi %33, %32 : vector<1x128xi32>
    %35 = vector.shape_cast %34 : vector<1x128xi32> to vector<1x1x128xi32>
    %36 = tpu.iota {dimensions = array<i32: 1>} : vector<2x16x128xi32>
    %37 = vector.broadcast %35 : vector<1x1x128xi32> to vector<2x16x128xi32>
    %38 = arith.cmpi sle, %36, %37 : vector<2x16x128xi32>
    %cst_28 = arith.constant 0xFF800000 : f32
    %39 = vector.broadcast %cst_28 : f32 to vector<2x16x128xf32>
    %40 = arith.select %38, %31, %39 : vector<2x16x128xi1>, vector<2x16x128xf32>
    %cst_29 = arith.constant dense<0xFF800000> : vector<2x128xf32>
    %41 = vector.multi_reduction <maximumf>, %40, %cst_29 [1] : vector<2x16x128xf32> to vector<2x128xf32>
    %c0_30 = arith.constant 0 : index
    %c0_31 = arith.constant 0 : index
    %42 = vector.load %arg5[%c0_30, %c0_31] : memref<1x128xf32, #tpu.memory_space<vmem>>, vector<1x128xf32>
    %43 = vector.broadcast %42 : vector<1x128xf32> to vector<2x128xf32>
    %44 = arith.addf %41, %43 : vector<2x128xf32>
    %cst_32 = arith.constant 0.000000e+00 : f32
    %45 = vector.broadcast %cst_32 : f32 to vector<2x128xf32>
    %46 = arith.maximumf %44, %45 : vector<2x128xf32>
    %c0_33 = arith.constant 0 : index
    %c0_34 = arith.constant 0 : index
    %47 = vector.load %arg6[%c0_33, %c0_34] : memref<128x128xf32, #tpu.memory_space<vmem>>, vector<128x128xf32>
    %cst_35 = arith.constant dense<0.000000e+00> : vector<2x128xf32>
    %48 = tpu.matmul %46, %47, %cst_35 {dimension_numbers = #tpu.dot_dimension_numbers<[1], [0], [0], [1], [0, 0, 1, 1], [], []>} : vector<2x128xf32>, vector<128x128xf32>, vector<2x128xf32> -> vector<2x128xf32>
    %c0_36 = arith.constant 0 : index
    %c0_37 = arith.constant 0 : index
    %49 = vector.load %arg7[%c0_36, %c0_37] : memref<1x128xf32, #tpu.memory_space<vmem>>, vector<1x128xf32>
    %50 = vector.broadcast %49 : vector<1x128xf32> to vector<2x128xf32>
    %51 = arith.addf %48, %50 : vector<2x128xf32>
    %cst_38 = arith.constant 0.000000e+00 : f32
    %52 = vector.broadcast %cst_38 : f32 to vector<2x128xf32>
    %53 = arith.maximumf %51, %52 : vector<2x128xf32>
    %c0_39 = arith.constant 0 : index
    %c0_40 = arith.constant 0 : index
    %54 = vector.load %arg8[%c0_39, %c0_40] : memref<128x1xf32, #tpu.memory_space<vmem>>, vector<128x1xf32>
    %cst_41 = arith.constant dense<0.000000e+00> : vector<2x1xf32>
    %55 = tpu.matmul %53, %54, %cst_41 {dimension_numbers = #tpu.dot_dimension_numbers<[1], [0], [0], [1], [0, 0, 1, 1], [], []>} : vector<2x128xf32>, vector<128x1xf32>, vector<2x1xf32> -> vector<2x1xf32>
    %c0_42 = arith.constant 0 : index
    %c0_43 = arith.constant 0 : index
    %56 = vector.load %arg9[%c0_42, %c0_43] : memref<1x1xf32, #tpu.memory_space<vmem>>, vector<1x1xf32>
    %57 = vector.broadcast %56 : vector<1x1xf32> to vector<2x1xf32>
    %58 = arith.addf %55, %57 : vector<2x1xf32>
    %c0_44 = arith.constant 0 : index
    %c0_45 = arith.constant 0 : index
    %59 = vector.load %arg10[%c0_44, %c0_45] : memref<2x1xf32, #tpu.memory_space<vmem>>, vector<2x1xf32>
    tpu.vector_store %arg10[%c0_44, %c0_45], %58 {strides = array<i32>} : memref<2x1xf32, #tpu.memory_space<vmem>>, vector<2x1xf32>,
    return
  }
  func.func @transform_0(%arg0: i32) -> (i32, i32) {
    %c0_i32 = arith.constant 0 : i32
    %c0_i32_0 = arith.constant 0 : i32
    return %arg0, %c0_i32 : i32, i32
  }
  func.func @transform_1(%arg0: i32) -> (i32, i32) {
    %c0_i32 = arith.constant 0 : i32
    %c0_i32_0 = arith.constant 0 : i32
    %c0_i32_1 = arith.constant 0 : i32
    return %c0_i32, %c0_i32_0 : i32, i32
  }
  func.func @transform_2(%arg0: i32) -> (i32, i32) {
    %c0_i32 = arith.constant 0 : i32
    %c0_i32_0 = arith.constant 0 : i32
    %c0_i32_1 = arith.constant 0 : i32
    return %c0_i32, %c0_i32_0 : i32, i32
  }
  func.func @transform_3(%arg0: i32) -> (i32, i32) {
    %c0_i32 = arith.constant 0 : i32
    %c0_i32_0 = arith.constant 0 : i32
    %c0_i32_1 = arith.constant 0 : i32
    return %c0_i32, %c0_i32_0 : i32, i32
  }
  func.func @transform_4(%arg0: i32) -> (i32, i32) {
    %c0_i32 = arith.constant 0 : i32
    %c0_i32_0 = arith.constant 0 : i32
    %c0_i32_1 = arith.constant 0 : i32
    return %c0_i32, %c0_i32_0 : i32, i32
  }
  func.func @transform_5(%arg0: i32) -> (i32, i32) {
    %c0_i32 = arith.constant 0 : i32
    %c0_i32_0 = arith.constant 0 : i32
    %c0_i32_1 = arith.constant 0 : i32
    return %c0_i32, %c0_i32_0 : i32, i32
  }
  func.func @transform_6(%arg0: i32) -> (i32, i32) {
    %c0_i32 = arith.constant 0 : i32
    %c0_i32_0 = arith.constant 0 : i32
    %c0_i32_1 = arith.constant 0 : i32
    return %c0_i32, %c0_i32_0 : i32, i32
  }
  func.func @transform_7(%arg0: i32) -> (i32, i32) {
    %c0_i32 = arith.constant 0 : i32
    %c0_i32_0 = arith.constant 0 : i32
    %c0_i32_1 = arith.constant 0 : i32
    return %c0_i32, %c0_i32_0 : i32, i32
  }
  func.func @transform_8(%arg0: i32) -> (i32, i32) {
    %c0_i32 = arith.constant 0 : i32
    %c0_i32_0 = arith.constant 0 : i32
    %c0_i32_1 = arith.constant 0 : i32
    return %c0_i32, %c0_i32_0 : i32, i32
  }
  func.func @transform_9(%arg0: i32) -> (i32, i32) {
    %c0_i32 = arith.constant 0 : i32
    %c0_i32_0 = arith.constant 0 : i32
    return %arg0, %c0_i32 : i32, i32
  }
}

</mosaic_0001>

<bundles_post_ra>
// kernel: tpu_custom_call.1
= control target key start
LH: loop header
LB: loop body
LE: loop exit
PB: predicated region body
PF: predicated region fallthrough
CT: control target
= control target key end

     0   :  { %s3138_s0 = inlined_call_operand.vmem [shape: s32[32,1], index: 0, kind: input, shape index: {}]   ;;  %s3139_s1 = inlined_call_operand.hbm [shape: bf16[256,640], index: 1, kind: input, shape index: {}]   ;;  %s3140_s2 = inlined_call_operand.hbm [shape: bf16[256,640], index: 2, kind: input, shape index: {}]   ;;  %s3141_s3 = inlined_call_operand.vmem [shape: s32[1,128], index: 3, kind: input, shape index: {}]   ;;  %s3142_s4 = inlined_call_operand.vmem [shape: f32[1,128], index: 4, kind: input, shape index: {}]   ;;  %s3143_s5 = inlined_call_operand.vmem [shape: f32[128,128], index: 5, kind: input, shape index: {}]   ;;  %s3144_s6 = inlined_call_operand.vmem [shape: f32[1,128], index: 6, kind: input, shape index: {}]   ;;  %s3145_s7 = inlined_call_operand.vmem [shape: f32[128,1], index: 7, kind: input, shape index: {}]   ;;  %s3146_s8 = inlined_call_operand.<no memory space> [shape: f32[1,1], index: 8, kind: input, shape index: {}]   ;;  %s3147_s9 = inlined_call_operand.vmem [shape: f32[2,1], index: 9, kind: output, shape index: {}]  }
   0x1   :  { %v14_v0 = vstv %s3146_s8 }
   0x2   :  { %15 = vst [vmem:[#allocation3] sm:$0x1] %v14_v0 }
   0x3   :  { %16 = vsyncpa [#allocation5], 0  ;;  %s24_s13 = sshll.u32 %s3139_s1, 4  ;;  %s25_s13 = int_to_ptr.hbm [resolvable:$true] %s24_s13 }
   0x4   :  { %17 = vsyncpa [#allocation7], 0  ;;  %s2717_s14 = smov [#allocation4]   ;;  %s37_s18 = sshll.u32 %s3140_s2, 4  ;;  %s38_s18 = int_to_ptr.hbm [resolvable:$true] %s37_s18 }
   0x5   :  { %s26_s15 = sshll.u32 %s2717_s14, 4  ;;  %s2718_s19 = smov 320   ;;  %s27_s15 = int_to_ptr.vmem [resolvable:$true] %s26_s15 }
   0x6   :  { %s2719_s20 = smov 20   ;;  %s2720_s8 = smov [#allocation6]  }
   0x7   :  { %32 = dma.hbm_to_vmem [thread:$0]  %s25_s13, 10240, %s27_s15, [#allocation5], %s2718_s19, %s2718_s19, %s2719_s20  }
   0x8   :  { %s39_s21 = sshll.u32 %s2720_s8, 4  ;;  %s40_s21 = int_to_ptr.vmem [resolvable:$true] %s39_s21 }
   0x9   :  { %45 = dma.hbm_to_vmem [thread:$0]  %s38_s18, 10240, %s40_s21, [#allocation7], %s2718_s19, %s2718_s19, %s2719_s20  }
   0xa   :  { %2713 = dma.done.wait [#allocation5], 10240  }
   0xb   :  { %2714 = vsyncadd [#allocation5], 4294957056 }
   0xc   :  { %2715 = dma.done.wait [#allocation7], 10240  }
   0xd   :  { %2716 = vsyncadd [#allocation7], 4294957056  ;;  %v2721_v1 = vmov 0   ;;  %v66_v2 = vld [vmem:[%s3138_s0] sm:$0xff]  ;;  %v68_v3 = vld [vmem:[%s3138_s0 + $0x10] sm:$0xff]  ;;  %vm1529_vm12 = vcmask 1046528  }
   0xe   :  { %2660 = vset.pattern.permute.xlu0 %v2721_v1  ;;  %2661 = vset.pattern.permute.xlu1 %v2721_v1  ;;  %v1916_v4 = vld [vmem:[#allocation6 + $0x118] sm:$0xf]  ;;  %v2611_v5 = vld [vmem:[#allocation6 + $0x128] sm:$0xf0]  ;;  %v2609_v9 = vld [vmem:[#allocation6 + $0x11c] sm:$0xf] }
   0xf   :  { %74 = vperm.xlu0 %2660, %v66_v2   ;;  %80 = vperm.xlu1 %2661, %v68_v3   ;;  %v1917_v6 = vor.u32 %v2611_v5, %v1916_v4  ;;  %v2076_v7 = vld [vmem:[#allocation6 + $0x258] sm:$0xf]  ;;  %v2651_v8 = vld [vmem:[#allocation6 + $0x268] sm:$0xf0]  ;;  %v1918_v11 = vld [vmem:[#allocation6 + $0x12c] sm:$0xf0] }
  0x10   :  { %v2077_v10 = vor.u32 %v2651_v8, %v2076_v7  ;;  %v2649_v12 = vld [vmem:[#allocation6 + $0x25c] sm:$0xf]  ;;  %v2078_v13 = vld [vmem:[#allocation6 + $0x26c] sm:$0xf0]  ;;  %v67_v14 = vld [vmem:[%s3138_s0 + $0x8] sm:$0xff]  ;;  %v1921_v16 = vor.u32 %v2609_v9, %v1918_v11  ;;  %vm1557_vm13 = vcmask 1045504  }
  0x11   :  { %v69_v15 = vld [vmem:[%s3138_s0 + $0x18] sm:$0xff]  ;;  %721 = vmatpush.bf16.msra.mxu0 %v1917_v6  ;;  %v2081_v17 = vor.u32 %v2649_v12, %v2078_v13  ;;  %v1896_v18 = vld [vmem:[#allocation6 + $0xf0] sm:$0xf]  ;;  %v2606_v19 = vld [vmem:[#allocation6 + $0x100] sm:$0xf0]  ;;  %vm1585_vm14 = vcmask 1044480  }
  0x12   :  { %v2056_v20 = vld [vmem:[#allocation6 + $0x230] sm:$0xf]  ;;  %740 = vmatpush.bf16.msra.mxu1 %v2077_v10  ;;  %v1897_v21 = vor.u32 %v2606_v19, %v1896_v18  ;;  %v2646_v22 = vld [vmem:[#allocation6 + $0x240] sm:$0xf0]  ;;  %v2604_v23 = vld [vmem:[#allocation6 + $0xf4] sm:$0xf]  ;;  %759 = vmatpush.bf16.msra.mxu2 %v1921_v16 }
  0x13   :  { %v1898_v24 = vld [vmem:[#allocation6 + $0x104] sm:$0xf0]  ;;  %778 = vmatpush.bf16.msra.mxu3 %v2081_v17  ;;  %v2057_v25 = vor.u32 %v2646_v22, %v2056_v20  ;;  %v2644_v27 = vld [vmem:[#allocation6 + $0x234] sm:$0xf]  ;;  %v2601_v31 = vld [vmem:[#allocation6 + $0xd8] sm:$0xf0] }
  0x14   :  { %v1901_v26 = vor.u32 %v2604_v23, %v1898_v24  ;;  %v2058_v28 = vld [vmem:[#allocation6 + $0x244] sm:$0xf0]  ;;  %v2641_v33 = vld [vmem:[#allocation6 + $0x218] sm:$0xf0]  ;;  %v2599_v35 = vld [vmem:[#allocation6 + $0xcc] sm:$0xf] }
  0x15   :  { %v1876_v29 = vld [vmem:[#allocation6 + $0xc8] sm:$0xf]  ;;  %v2061_v30 = vor.u32 %v2644_v27, %v2058_v28  ;;  %722 = vmatpush.bf16.msra.mxu0 %v1897_v21  ;;  %v1878_v36 = vld [vmem:[#allocation6 + $0xdc] sm:$0xf0]  ;;  %v2639_v37 = vld [vmem:[#allocation6 + $0x20c] sm:$0xf] }
  0x16   :  { %v2036_v32 = vld [vmem:[#allocation6 + $0x208] sm:$0xf]  ;;  %v1877_v34 = vor.u32 %v2601_v31, %v1876_v29  ;;  %v2038_v38 = vld [vmem:[#allocation6 + $0x21c] sm:$0xf0]  ;;  %v2596_v40 = vld [vmem:[#allocation6 + $0xb0] sm:$0xf0]  ;;  %741 = vmatpush.bf16.msra.mxu1 %v2057_v25  ;;  %760 = vmatpush.bf16.msra.mxu2 %v1901_v26  ;;  %v1881_v42 = vor.u32 %v2599_v35, %v1878_v36 }
  0x17   :  { %77 = vperm.xlu0 %2660, %v67_v14   ;;  %83 = vperm.xlu1 %2661, %v69_v15   ;;  %v1856_v39 = vld [vmem:[#allocation6 + $0xa0] sm:$0xf]  ;;  %v2037_v41 = vor.u32 %v2641_v33, %v2036_v32  ;;  %v2041_v44 = vor.u32 %v2639_v37, %v2038_v38  ;;  %v2636_v45 = vld [vmem:[#allocation6 + $0x1f0] sm:$0xf0]  ;;  %v2594_v46 = vld [vmem:[#allocation6 + $0xa4] sm:$0xf] }
  0x18   :  { %v2016_v43 = vld [vmem:[#allocation6 + $0x1e0] sm:$0xf]  ;;  %779 = vmatpush.bf16.msra.mxu3 %v2061_v30  ;;  %v1858_v47 = vld [vmem:[#allocation6 + $0xb4] sm:$0xf0]  ;;  %v1857_v48 = vor.u32 %v2596_v40, %v1856_v39  ;;  %v2634_v49 = vld [vmem:[#allocation6 + $0x1e4] sm:$0xf] }
  0x19   :  { %723 = vmatpush.bf16.msra.mxu0 %v1877_v34  ;;  %v2018_v50 = vld [vmem:[#allocation6 + $0x1f4] sm:$0xf0]  ;;  %v2591_v52 = vld [vmem:[#allocation6 + $0x88] sm:$0xf0]  ;;  %v2017_v53 = vor.u32 %v2636_v45, %v2016_v43  ;;  %v1861_v54 = vor.u32 %v2594_v46, %v1858_v47  ;;  %v2589_v58 = vld [vmem:[#allocation6 + $0x7c] sm:$0xf] }
  0x1a   :  { %v1836_v51 = vld [vmem:[#allocation6 + $0x78] sm:$0xf]  ;;  %742 = vmatpush.bf16.msra.mxu1 %v2037_v41  ;;  %761 = vmatpush.bf16.msra.mxu2 %v1881_v42  ;;  %v2021_v56 = vor.u32 %v2634_v49, %v2018_v50  ;;  %v2631_v57 = vld [vmem:[#allocation6 + $0x1c8] sm:$0xf0]  ;;  %v1838_v59 = vld [vmem:[#allocation6 + $0x8c] sm:$0xf0] }
  0x1b   :  { %v1996_v55 = vld [vmem:[#allocation6 + $0x1b8] sm:$0xf]  ;;  %v1837_v60 = vor.u32 %v2591_v52, %v1836_v51  ;;  %v2629_v61 = vld [vmem:[#allocation6 + $0x1bc] sm:$0xf]  ;;  %v1998_v62 = vld [vmem:[#allocation6 + $0x1cc] sm:$0xf0]  ;;  %v1841_v2 = vor.u32 %v2589_v58, %v1838_v59 }
  0x1c   :  { %780 = vmatpush.bf16.msra.mxu3 %v2041_v44  ;;  %v1816_v63 = vld [vmem:[#allocation6 + $0x50] sm:$0xf]  ;;  %v2586_v0 = vld [vmem:[#allocation6 + $0x60] sm:$0xf0]  ;;  %v1997_v1 = vor.u32 %v2631_v57, %v1996_v55  ;;  %v2001_v4 = vor.u32 %v2629_v61, %v1998_v62  ;;  %v2584_v6 = vld [vmem:[#allocation6 + $0x54] sm:$0xf] }
  0x1d   :  { %724 = vmatpush.bf16.msra.mxu0 %v1857_v48  ;;  %v1976_v3 = vld [vmem:[#allocation6 + $0x190] sm:$0xf]  ;;  %v2626_v5 = vld [vmem:[#allocation6 + $0x1a0] sm:$0xf0]  ;;  %v1818_v7 = vld [vmem:[#allocation6 + $0x64] sm:$0xf0]  ;;  %v1817_v8 = vor.u32 %v2586_v0, %v1816_v63 }
  0x1e   :  { %743 = vmatpush.bf16.msra.mxu1 %v2017_v53  ;;  %762 = vmatpush.bf16.msra.mxu2 %v1861_v54  ;;  %v2624_v9 = vld [vmem:[#allocation6 + $0x194] sm:$0xf]  ;;  %v1978_v10 = vld [vmem:[#allocation6 + $0x1a4] sm:$0xf0]  ;;  %v1977_v11 = vor.u32 %v2626_v5, %v1976_v3  ;;  %v1821_v12 = vor.u32 %v2584_v6, %v1818_v7  ;;  %v2581_v15 = vld [vmem:[#allocation6 + $0x38] sm:$0xf0] }
  0x1f   :  { %v1981_v13 = vor.u32 %v2624_v9, %v1978_v10  ;;  %v1796_v14 = vld [vmem:[#allocation6 + $0x28] sm:$0xf]  ;;  %v2621_v18 = vld [vmem:[#allocation6 + $0x178] sm:$0xf0]  ;;  %v2579_v19 = vld [vmem:[#allocation6 + $0x2c] sm:$0xf] }
  0x20   :  { %781 = vmatpush.bf16.msra.mxu3 %v2021_v56  ;;  %v1956_v16 = vld [vmem:[#allocation6 + $0x168] sm:$0xf]  ;;  %v1797_v17 = vor.u32 %v2581_v15, %v1796_v14  ;;  %v1798_v20 = vld [vmem:[#allocation6 + $0x3c] sm:$0xf0]  ;;  %v2619_v23 = vld [vmem:[#allocation6 + $0x16c] sm:$0xf] }
  0x21   :  { %725 = vmatpush.bf16.msra.mxu0 %v1837_v60  ;;  %v1957_v21 = vor.u32 %v2621_v18, %v1956_v16  ;;  %v1801_v22 = vor.u32 %v2579_v19, %v1798_v20  ;;  %v1958_v24 = vld [vmem:[#allocation6 + $0x17c] sm:$0xf0]  ;;  %v2576_v27 = vld [vmem:[#allocation6 + $0x10] sm:$0xf0]  ;;  %v2574_v32 = vld [vmem:[#allocation6 + $0x4] sm:$0xf]  ;;  %v70_v18 = vlaneseq }
  0x22   :  { %744 = vmatpush.bf16.msra.mxu1 %v1997_v1  ;;  %763 = vmatpush.bf16.msra.mxu2 %v1841_v2  ;;  %v1776_v25 = vld [vmem:[#allocation6] sm:$0xf]  ;;  %v1961_v26 = vor.u32 %v2619_v23, %v1958_v24  ;;  %v2616_v29 = vld [vmem:[#allocation6 + $0x150] sm:$0xf0]  ;;  %v1778_v33 = vld [vmem:[#allocation6 + $0x14] sm:$0xf0] }
  0x23   :  { %v1936_v28 = vld [vmem:[#allocation6 + $0x140] sm:$0xf]  ;;  %v1777_v30 = vor.u32 %v2576_v27, %v1776_v25  ;;  %v2614_v34 = vld [vmem:[#allocation6 + $0x144] sm:$0xf]  ;;  %v1781_v35 = vor.u32 %v2574_v32, %v1778_v33  ;;  %v1938_v36 = vld [vmem:[#allocation6 + $0x154] sm:$0xf0] }
  0x24   :  { %782 = vmatpush.bf16.msra.mxu3 %v2001_v4  ;;  %v1937_v31 = vor.u32 %v2616_v29, %v1936_v28  ;;  %v1941_v37 = vor.u32 %v2614_v34, %v1938_v36  ;;  %v1924_v38 = vld [vmem:[#allocation6 + $0x120] sm:$0xf]  ;;  %v2612_v39 = vld [vmem:[#allocation6 + $0x130] sm:$0xf0]  ;;  %v2610_v43 = vld [vmem:[#allocation6 + $0x124] sm:$0xf] }
  0x25   :  { %726 = vmatpush.bf16.msra.mxu0 %v1817_v8  ;;  %v2084_v40 = vld [vmem:[#allocation6 + $0x260] sm:$0xf]  ;;  %v1925_v41 = vor.u32 %v2612_v39, %v1924_v38  ;;  %v2652_v42 = vld [vmem:[#allocation6 + $0x270] sm:$0xf0]  ;;  %v1926_v45 = vld [vmem:[#allocation6 + $0x134] sm:$0xf0] }
  0x26   :  { %745 = vmatpush.bf16.msra.mxu1 %v1977_v11  ;;  %764 = vmatpush.bf16.msra.mxu2 %v1821_v12  ;;  %v2085_v44 = vor.u32 %v2652_v42, %v2084_v40  ;;  %v2650_v46 = vld [vmem:[#allocation6 + $0x264] sm:$0xf]  ;;  %v2086_v47 = vld [vmem:[#allocation6 + $0x274] sm:$0xf0]  ;;  %v1929_v48 = vor.u32 %v2610_v43, %v1926_v45  ;;  %v2607_v51 = vld [vmem:[#allocation6 + $0x108] sm:$0xf0] }
  0x27   :  { %v2089_v49 = vor.u32 %v2650_v46, %v2086_v47  ;;  %v1904_v50 = vld [vmem:[#allocation6 + $0xf8] sm:$0xf]  ;;  %v2647_v54 = vld [vmem:[#allocation6 + $0x248] sm:$0xf0]  ;;  %v2605_v55 = vld [vmem:[#allocation6 + $0xfc] sm:$0xf] }
  0x28   :  { %783 = vmatpush.bf16.msra.mxu3 %v1981_v13  ;;  %v2064_v52 = vld [vmem:[#allocation6 + $0x238] sm:$0xf]  ;;  %v1905_v53 = vor.u32 %v2607_v51, %v1904_v50  ;;  %v1906_v56 = vld [vmem:[#allocation6 + $0x10c] sm:$0xf0]  ;;  %v2645_v59 = vld [vmem:[#allocation6 + $0x23c] sm:$0xf] }
  0x29   :  { %727 = vmatpush.bf16.msra.mxu0 %v1797_v17  ;;  %v2065_v57 = vor.u32 %v2647_v54, %v2064_v52  ;;  %v1909_v58 = vor.u32 %v2605_v55, %v1906_v56  ;;  %v2066_v60 = vld [vmem:[#allocation6 + $0x24c] sm:$0xf0]  ;;  %v2602_v63 = vld [vmem:[#allocation6 + $0xe0] sm:$0xf0]  ;;  %v2600_v3 = vld [vmem:[#allocation6 + $0xd4] sm:$0xf] }
  0x2a   :  { %746 = vmatpush.bf16.msra.mxu1 %v1957_v21  ;;  %765 = vmatpush.bf16.msra.mxu2 %v1801_v22  ;;  %v1884_v61 = vld [vmem:[#allocation6 + $0xd0] sm:$0xf]  ;;  %v2069_v62 = vor.u32 %v2645_v59, %v2066_v60  ;;  %v2642_v1 = vld [vmem:[#allocation6 + $0x220] sm:$0xf0]  ;;  %v1886_v4 = vld [vmem:[#allocation6 + $0xe4] sm:$0xf0] }
  0x2b   :  { %v2044_v0 = vld [vmem:[#allocation6 + $0x210] sm:$0xf]  ;;  %v1885_v2 = vor.u32 %v2602_v63, %v1884_v61  ;;  %v2640_v5 = vld [vmem:[#allocation6 + $0x214] sm:$0xf]  ;;  %v2046_v7 = vld [vmem:[#allocation6 + $0x224] sm:$0xf0]  ;;  %v1889_v10 = vor.u32 %v2600_v3, %v1886_v4 }
  0x2c   :  { %784 = vmatpush.bf16.msra.mxu3 %v1961_v26  ;;  %v2045_v6 = vor.u32 %v2642_v1, %v2044_v0  ;;  %v1864_v8 = vld [vmem:[#allocation6 + $0xa8] sm:$0xf]  ;;  %v2597_v9 = vld [vmem:[#allocation6 + $0xb8] sm:$0xf0]  ;;  %v2049_v11 = vor.u32 %v2640_v5, %v2046_v7  ;;  %v2595_v14 = vld [vmem:[#allocation6 + $0xac] sm:$0xf] }
  0x2d   :  { %728 = vmatpush.bf16.msra.mxu0 %v1777_v30  ;;  %v2024_v12 = vld [vmem:[#allocation6 + $0x1e8] sm:$0xf]  ;;  %v2637_v13 = vld [vmem:[#allocation6 + $0x1f8] sm:$0xf0]  ;;  %v1866_v15 = vld [vmem:[#allocation6 + $0xbc] sm:$0xf0]  ;;  %v1865_v19 = vor.u32 %v2597_v9, %v1864_v8 }
  0x2e   :  { %747 = vmatpush.bf16.msra.mxu1 %v1937_v31  ;;  %766 = vmatpush.bf16.msra.mxu2 %v1781_v35  ;;  %v2635_v16 = vld [vmem:[#allocation6 + $0x1ec] sm:$0xf]  ;;  %v2026_v17 = vld [vmem:[#allocation6 + $0x1fc] sm:$0xf0]  ;;  %v2025_v20 = vor.u32 %v2637_v13, %v2024_v12  ;;  %v1869_v21 = vor.u32 %v2595_v14, %v1866_v15  ;;  %v2795_v23 = vand.u32 127, %v70_v18  ;;  %vm1613_vm15 = vcmask 1043456  }
  0x2f   :  { %v2029_v22 = vor.u32 %v2635_v16, %v2026_v17  ;;  %v1844_v24 = vld [vmem:[#allocation6 + $0x80] sm:$0xf]  ;;  %v2592_v25 = vld [vmem:[#allocation6 + $0x90] sm:$0xf0]  ;;  %v2590_v29 = vld [vmem:[#allocation6 + $0x84] sm:$0xf] }
  0x30   :  { %785 = vmatpush.bf16.msra.mxu3 %v1941_v37  ;;  %v2004_v26 = vld [vmem:[#allocation6 + $0x1c0] sm:$0xf]  ;;  %v1845_v27 = vor.u32 %v2592_v25, %v1844_v24  ;;  %v2632_v28 = vld [vmem:[#allocation6 + $0x1d0] sm:$0xf0]  ;;  %v1846_v30 = vld [vmem:[#allocation6 + $0x94] sm:$0xf0] }
  0x31   :  { %797 = vmatpush.bf16.msrb.mxu0 %v1925_v41  ;;  %v2005_v31 = vor.u32 %v2632_v28, %v2004_v26  ;;  %v1849_v32 = vor.u32 %v2590_v29, %v1846_v30  ;;  %v2630_v33 = vld [vmem:[#allocation6 + $0x1c4] sm:$0xf]  ;;  %v2006_v34 = vld [vmem:[#allocation6 + $0x1d4] sm:$0xf0]  ;;  %v2587_v37 = vld [vmem:[#allocation6 + $0x68] sm:$0xf0] }
  0x32   :  { %816 = vmatpush.bf16.msrb.mxu1 %v2085_v44  ;;  %835 = vmatpush.bf16.msrb.mxu2 %v1929_v48  ;;  %v1824_v35 = vld [vmem:[#allocation6 + $0x58] sm:$0xf]  ;;  %v2009_v36 = vor.u32 %v2630_v33, %v2006_v34  ;;  %v2627_v39 = vld [vmem:[#allocation6 + $0x1a8] sm:$0xf0]  ;;  %v2585_v42 = vld [vmem:[#allocation6 + $0x5c] sm:$0xf] }
  0x33   :  { %v1984_v38 = vld [vmem:[#allocation6 + $0x198] sm:$0xf]  ;;  %v1825_v40 = vor.u32 %v2587_v37, %v1824_v35  ;;  %v1826_v43 = vld [vmem:[#allocation6 + $0x6c] sm:$0xf0]  ;;  %v2625_v44 = vld [vmem:[#allocation6 + $0x19c] sm:$0xf] }
  0x34   :  { %854 = vmatpush.bf16.msrb.mxu3 %v2089_v49  ;;  %v1985_v41 = vor.u32 %v2627_v39, %v1984_v38  ;;  %v1829_v45 = vor.u32 %v2585_v42, %v1826_v43  ;;  %v1986_v46 = vld [vmem:[#allocation6 + $0x1ac] sm:$0xf0]  ;;  %v2582_v48 = vld [vmem:[#allocation6 + $0x40] sm:$0xf0]  ;;  %v1806_v55 = vld [vmem:[#allocation6 + $0x44] sm:$0xf0] }
  0x35   :  { %798 = vmatpush.bf16.msrb.mxu0 %v1905_v53  ;;  %v1804_v47 = vld [vmem:[#allocation6 + $0x30] sm:$0xf]  ;;  %v1989_v50 = vor.u32 %v2625_v44, %v1986_v46  ;;  %v2622_v52 = vld [vmem:[#allocation6 + $0x180] sm:$0xf0]  ;;  %v2580_v53 = vld [vmem:[#allocation6 + $0x34] sm:$0xf] }
  0x36   :  { %817 = vmatpush.bf16.msrb.mxu1 %v2065_v57  ;;  %836 = vmatpush.bf16.msrb.mxu2 %v1909_v58  ;;  %v1964_v51 = vld [vmem:[#allocation6 + $0x170] sm:$0xf]  ;;  %v1805_v54 = vor.u32 %v2582_v48, %v1804_v47  ;;  %v2620_v56 = vld [vmem:[#allocation6 + $0x174] sm:$0xf]  ;;  %v1966_v57 = vld [vmem:[#allocation6 + $0x184] sm:$0xf0]  ;;  %v1809_v61 = vor.u32 %v2580_v53, %v1806_v55 }
  0x37   :  { %v1965_v58 = vor.u32 %v2622_v52, %v1964_v51  ;;  %v1784_v59 = vld [vmem:[#allocation6 + $0x8] sm:$0xf]  ;;  %v2577_v60 = vld [vmem:[#allocation6 + $0x18] sm:$0xf0]  ;;  %v2798_v1 = vadd.s32 128, %v2795_v23 }
  0x38   :  { %855 = vmatpush.bf16.msrb.mxu3 %v2069_v62  ;;  %v1969_v62 = vor.u32 %v2620_v56, %v1966_v57  ;;  %v1944_v63 = vld [vmem:[#allocation6 + $0x148] sm:$0xf]  ;;  %v2617_v0 = vld [vmem:[#allocation6 + $0x158] sm:$0xf0]  ;;  %v2575_v3 = vld [vmem:[#allocation6 + $0xc] sm:$0xf] }
  0x39   :  { %799 = vmatpush.bf16.msrb.mxu0 %v1885_v2  ;;  %v1785_v2 = vor.u32 %v2577_v60, %v1784_v59  ;;  %v1945_v4 = vor.u32 %v2617_v0, %v1944_v63  ;;  %v1786_v5 = vld [vmem:[#allocation6 + $0x1c] sm:$0xf0]  ;;  %v1932_v13 = vld [vmem:[#allocation6 + $0x128] sm:$0xf]  ;;  %v2613_v14 = vld [vmem:[#allocation6 + $0x138] sm:$0xf0] }
  0x3a   :  { %818 = vmatpush.bf16.msrb.mxu1 %v2045_v6  ;;  %837 = vmatpush.bf16.msrb.mxu2 %v1889_v10  ;;  %v2615_v6 = vld [vmem:[#allocation6 + $0x14c] sm:$0xf]  ;;  %v1946_v7 = vld [vmem:[#allocation6 + $0x15c] sm:$0xf0]  ;;  %v1789_v10 = vor.u32 %v2575_v3, %v1786_v5  ;;  %v2722_v16 = vmov 1.0|1.0   ;;  %v1933_v17 = vor.u32 %v2613_v14, %v1932_v13 }
  0x3b   :  { %v2531_v24 = vld [vmem:[#allocation4 + $0x128] sm:$0xf0]  ;;  %v2436_v26 = vld [vmem:[#allocation4 + $0x258] sm:$0xf]  ;;  %v1912_v29 = vld [vmem:[#allocation6 + $0x100] sm:$0xf] }
  0x3c   :  { %856 = vmatpush.bf16.msrb.mxu3 %v2049_v11  ;;  %v1949_v11 = vor.u32 %v2615_v6, %v1946_v7  ;;  %v2608_v30 = vld [vmem:[#allocation6 + $0x110] sm:$0xf0]  ;;  %v2256_v34 = vld [vmem:[#allocation4 + $0xf0] sm:$0xf]  ;;  %v2526_v35 = vld [vmem:[#allocation4 + $0x100] sm:$0xf0] }
  0x3d   :  { %800 = vmatpush.bf16.msrb.mxu0 %v1865_v19  ;;  %v2092_v19 = vld [vmem:[#allocation6 + $0x268] sm:$0xf]  ;;  %v2648_v33 = vld [vmem:[#allocation6 + $0x250] sm:$0xf0]  ;;  %v2257_v37 = vor.u32 %v2526_v35, %v2256_v34  ;;  %v2416_v38 = vld [vmem:[#allocation4 + $0x230] sm:$0xf] }
  0x3e   :  { %819 = vmatpush.bf16.msrb.mxu1 %v2025_v20  ;;  %838 = vmatpush.bf16.msrb.mxu2 %v1869_v21  ;;  %v2653_v20 = vld [vmem:[#allocation6 + $0x278] sm:$0xf0]  ;;  %v2566_v39 = vld [vmem:[#allocation4 + $0x240] sm:$0xf0]  ;;  %v2603_v42 = vld [vmem:[#allocation6 + $0xe8] sm:$0xf0] }
  0x3f   :  { %v2093_v21 = vor.u32 %v2653_v20, %v2092_v19  ;;  %v2052_v43 = vld [vmem:[#allocation6 + $0x218] sm:$0xf]  ;;  %v2643_v44 = vld [vmem:[#allocation6 + $0x228] sm:$0xf0]  ;;  %v2236_v48 = vld [vmem:[#allocation4 + $0xc8] sm:$0xf] }
  0x40   :  { %857 = vmatpush.bf16.msrb.mxu3 %v2029_v22  ;;  %v2276_v22 = vld [vmem:[#allocation4 + $0x118] sm:$0xf]  ;;  %v2053_v47 = vor.u32 %v2643_v44, %v2052_v43  ;;  %v2561_v52 = vld [vmem:[#allocation4 + $0x218] sm:$0xf0]  ;;  %v1872_v53 = vld [vmem:[#allocation6 + $0xb0] sm:$0xf] }
  0x41   :  { %801 = vmatpush.bf16.msrb.mxu0 %v1845_v27  ;;  %v2277_v25 = vor.u32 %v2531_v24, %v2276_v22  ;;  %v2571_v27 = vld [vmem:[#allocation4 + $0x268] sm:$0xf0]  ;;  %v2032_v56 = vld [vmem:[#allocation6 + $0x1f0] sm:$0xf]  ;;  %v2638_v57 = vld [vmem:[#allocation6 + $0x200] sm:$0xf0] }
  0x42   :  { %820 = vmatpush.bf16.msrb.mxu1 %v2005_v31  ;;  %839 = vmatpush.bf16.msrb.mxu2 %v1849_v32  ;;  %v2437_v28 = vor.u32 %v2571_v27, %v2436_v26  ;;  %v2072_v31 = vld [vmem:[#allocation6 + $0x240] sm:$0xf]  ;;  %v1913_v32 = vor.u32 %v2608_v30, %v1912_v29  ;;  %v2033_v60 = vor.u32 %v2638_v57, %v2032_v56  ;;  %v2556_v63 = vld [vmem:[#allocation4 + $0x1f0] sm:$0xf0]  ;;  %v2012_v5 = vld [vmem:[#allocation6 + $0x1c8] sm:$0xf] }
  0x43   :  { %v2633_v7 = vld [vmem:[#allocation6 + $0x1d8] sm:$0xf0]  ;;  %v2551_v13 = vld [vmem:[#allocation4 + $0x1c8] sm:$0xf0]  ;;  %v1832_v14 = vld [vmem:[#allocation6 + $0x60] sm:$0xf] }
  0x44   :  { %858 = vmatpush.bf16.msrb.mxu3 %v2009_v36  ;;  %v2073_v36 = vor.u32 %v2648_v33, %v2072_v31  ;;  %v2588_v20 = vld [vmem:[#allocation6 + $0x70] sm:$0xf0]  ;;  %v2176_v26 = vld [vmem:[#allocation4 + $0x50] sm:$0xf]  ;;  %v2506_v27 = vld [vmem:[#allocation4 + $0x60] sm:$0xf0] }
  0x45   :  { %802 = vmatpush.bf16.msrb.mxu0 %v1825_v40  ;;  %v1892_v40 = vld [vmem:[#allocation6 + $0xd8] sm:$0xf]  ;;  %v2628_v22 = vld [vmem:[#allocation6 + $0x1b0] sm:$0xf0]  ;;  %v1833_v24 = vor.u32 %v2588_v20, %v1832_v14  ;;  %v2546_v29 = vld [vmem:[#allocation4 + $0x1a0] sm:$0xf0]  ;;  %v2177_v34 = vor.u32 %v2506_v27, %v2176_v26 }
  0x46   :  { %821 = vmatpush.bf16.msrb.mxu1 %v1985_v41  ;;  %840 = vmatpush.bf16.msrb.mxu2 %v1829_v45  ;;  %v2417_v41 = vor.u32 %v2566_v39, %v2416_v38  ;;  %v1893_v46 = vor.u32 %v2603_v42, %v1892_v40  ;;  %v1812_v30 = vld [vmem:[#allocation6 + $0x38] sm:$0xf]  ;;  %v2583_v31 = vld [vmem:[#allocation6 + $0x48] sm:$0xf0]  ;;  %v2316_v40 = vld [vmem:[#allocation4 + $0x168] sm:$0xf] }
  0x47   :  { %v2623_v33 = vld [vmem:[#allocation6 + $0x188] sm:$0xf0]  ;;  %v1813_v38 = vor.u32 %v2583_v31, %v1812_v30  ;;  %v1792_v42 = vld [vmem:[#allocation6 + $0x10] sm:$0xf]  ;;  %v2578_v43 = vld [vmem:[#allocation6 + $0x20] sm:$0xf0] }
  0x48   :  { %859 = vmatpush.bf16.msrb.mxu3 %v1989_v50  ;;  %v2396_v50 = vld [vmem:[#allocation4 + $0x208] sm:$0xf]  ;;  %v1952_v44 = vld [vmem:[#allocation6 + $0x150] sm:$0xf]  ;;  %v2529_v56 = vld [vmem:[#allocation4 + $0x11c] sm:$0xf] }
  0x49   :  { %803 = vmatpush.bf16.msrb.mxu0 %v1805_v54  ;;  %v2598_v54 = vld [vmem:[#allocation6 + $0xc0] sm:$0xf0]  ;;  %v2397_v55 = vor.u32 %v2561_v52, %v2396_v50  ;;  %v2296_v52 = vld [vmem:[#allocation4 + $0x140] sm:$0xf]  ;;  %v2278_v57 = vld [vmem:[#allocation4 + $0x12c] sm:$0xf0] }
  0x4a   :  { %822 = vmatpush.bf16.msrb.mxu1 %v1965_v58  ;;  %841 = vmatpush.bf16.msrb.mxu2 %v1809_v61  ;;  %v2216_v58 = vld [vmem:[#allocation4 + $0xa0] sm:$0xf]  ;;  %v1873_v59 = vor.u32 %v2598_v54, %v1872_v53  ;;  %v2516_v61 = vld [vmem:[#allocation4 + $0xb0] sm:$0xf0]  ;;  %v2424_v14 = vld [vmem:[#allocation4 + $0x238] sm:$0xf] }
  0x4b   :  { %v2536_v53 = vld [vmem:[#allocation4 + $0x150] sm:$0xf0]  ;;  %v2519_v20 = vld [vmem:[#allocation4 + $0xcc] sm:$0xf]  ;;  %v2244_v26 = vld [vmem:[#allocation4 + $0xd0] sm:$0xf] }
  0x4c   :  { %860 = vmatpush.bf16.msrb.mxu3 %v1969_v62  ;;  %v2376_v62 = vld [vmem:[#allocation4 + $0x1e0] sm:$0xf]  ;;  %v2522_v27 = vld [vmem:[#allocation4 + $0xe0] sm:$0xf0] }
  0x4d   :  { %804 = vmatpush.bf16.msrb.mxu0 %v1785_v2  ;;  %v2377_v3 = vor.u32 %v2556_v63, %v2376_v62  ;;  %v2532_v62 = vld [vmem:[#allocation4 + $0x130] sm:$0xf0] }
  0x4e   :  { %823 = vmatpush.bf16.msrb.mxu1 %v1945_v4  ;;  %842 = vmatpush.bf16.msrb.mxu2 %v1789_v10  ;;  %v2593_v4 = vld [vmem:[#allocation6 + $0x98] sm:$0xf0]  ;;  %v2013_v10 = vor.u32 %v2633_v7, %v2012_v5  ;;  %v2564_v7 = vld [vmem:[#allocation4 + $0x234] sm:$0xf] }
  0x50   :  { %861 = vmatpush.bf16.msrb.mxu3 %v1949_v11  ;;  %v2356_v11 = vld [vmem:[#allocation4 + $0x1b8] sm:$0xf] }
  0x51   :  { %v2357_v19 = vor.u32 %v2551_v13, %v2356_v11  ;;  %v2264_v11 = vld [vmem:[#allocation4 + $0xf8] sm:$0xf]  ;;  %v2527_v13 = vld [vmem:[#allocation4 + $0x108] sm:$0xf0] }
  0x81   :  { %v75_v49 = vpop.permute.xlu0 %74  ;;  %v2801_v8 = vpop.permute.xlu1 %80 }
  0x82   :  { %vm85_vm0 = vcmp.eq.s32.totalorder %v2795_v23, %v75_v49  ;;  %vm86_vm3 = vcmp.eq.s32.totalorder %v2798_v1, %v75_v49  ;;  %v2521_v49 = vld [vmem:[#allocation4 + $0xd8] sm:$0xf0]  ;;  %vm89_vm6 = vcmp.eq.s32.totalorder %v2795_v23, %v2801_v8  ;;  %vm90_vm7 = vcmp.eq.s32.totalorder %v2798_v1, %v2801_v8  ;;  %v2196_v8 = vld [vmem:[#allocation4 + $0x78] sm:$0xf] }
  0x83   :  { %v2237_v51 = vor.u32 %v2521_v49, %v2236_v48  ;;  %v2136_v48 = vld [vmem:[#allocation4] sm:$0xf]  ;;  %v1793_v49 = vor.u32 %v2578_v43, %v1792_v42  ;;  %v2384_v42 = vld [vmem:[#allocation4 + $0x1e8] sm:$0xf]  ;;  %v2557_v43 = vld [vmem:[#allocation4 + $0x1f8] sm:$0xf0] }
  0x89   :  { %v78_v9 = vpop.permute.xlu0 %77  ;;  %v84_v45 = vpop.permute.xlu1 %83 }
  0x8a   :  { %vm87_vm1 = vcmp.eq.s32.totalorder %v2795_v23, %v78_v9  ;;  %vm88_vm2 = vcmp.eq.s32.totalorder %v2798_v1, %v78_v9  ;;  %vm91_vm8 = vcmp.eq.s32.totalorder %v2795_v23, %v84_v45  ;;  %vm92_vm9 = vcmp.eq.s32.totalorder %v2798_v1, %v84_v45  ;;  %v1852_v1 = vld [vmem:[#allocation6 + $0x88] sm:$0xf]  ;;  %v2511_v9 = vld [vmem:[#allocation4 + $0x88] sm:$0xf0]  ;;  %v2618_v45 = vld [vmem:[#allocation6 + $0x160] sm:$0xf0] }
  0x8b   :  { %vm2806_vm4 = vmpackc.low %vm87_vm1, %vm85_vm0  ;;  %v2217_v23 = vor.u32 %v2516_v61, %v2216_v58  ;;  %v1853_v6 = vor.u32 %v2593_v4, %v1852_v1  ;;  %v1953_v50 = vor.u32 %v2618_v45, %v1952_v44  ;;  %v2569_v58 = vld [vmem:[#allocation4 + $0x25c] sm:$0xf]  ;;  %v2284_v61 = vld [vmem:[#allocation4 + $0x120] sm:$0xf]  ;;  %v2385_v45 = vor.u32 %v2557_v43, %v2384_v42 }
  0x8c   :  { %vm2810_vm5 = vmpackc.low %vm88_vm2, %vm86_vm3  ;;  %2095 = vmatmul.msk.bf16.vlgmr.msra.gmra.mxu0 %vm2806_vm4, %v2722_v16  ;;  %2103 = vmatmul.msk.bf16.vlgmr.msra.gmra.mxu2 %vm2806_vm4, %v2722_v16  ;;  %v2572_v1 = vld [vmem:[#allocation4 + $0x270] sm:$0xf0]  ;;  %v2533_v42 = vld [vmem:[#allocation4 + $0x138] sm:$0xf0]  ;;  %vm1694_vm2 = vcmask 1041409   ;;  %vm1758_vm3 = vcmask 1024  }
  0x8d   :  { %2099 = vmatmul.msk.bf16.vlgmr.msra.gmra.mxu1 %vm2810_vm5, %v2722_v16  ;;  %2107 = vmatmul.msk.bf16.vlgmr.msra.gmra.mxu3 %vm2810_vm5, %v2722_v16  ;;  %vm2832_vm10 = vmpackc.low %vm91_vm8, %vm89_vm6  ;;  %v2524_v4 = vld [vmem:[#allocation4 + $0xf4] sm:$0xf] }
  0x8e   :  { %873 = vmatpush.bf16.msra.mxu0 %v1933_v17  ;;  %892 = vmatpush.bf16.msra.mxu1 %v2093_v21  ;;  %vm2836_vm11 = vmpackc.low %vm92_vm9, %vm90_vm7  ;;  %v2197_v17 = vor.u32 %v2511_v9, %v2196_v8  ;;  %v1992_v21 = vld [vmem:[#allocation6 + $0x1a0] sm:$0xf]  ;;  %v2418_v8 = vld [vmem:[#allocation4 + $0x244] sm:$0xf0] }
  0x8f   :  { %1327 = vmatpush.bf16.msra.mxu2 %v2277_v25  ;;  %1346 = vmatpush.bf16.msra.mxu3 %v2437_v28  ;;  %v1993_v25 = vor.u32 %v2628_v22, %v1992_v21  ;;  %v2336_v28 = vld [vmem:[#allocation4 + $0x190] sm:$0xf]  ;;  %v2238_v21 = vld [vmem:[#allocation4 + $0xdc] sm:$0xf0] }
  0x90   :  { %v2337_v35 = vor.u32 %v2546_v29, %v2336_v28  ;;  %v2404_v28 = vld [vmem:[#allocation4 + $0x210] sm:$0xf]  ;;  %v2562_v29 = vld [vmem:[#allocation4 + $0x220] sm:$0xf0]  ;;  %v2241_v30 = vor.u32 %v2519_v20, %v2238_v21 }
  0x91   :  { %v2542_v20 = vld [vmem:[#allocation4 + $0x180] sm:$0xf0] }
  0x92   :  { %874 = vmatpush.bf16.msra.mxu0 %v1913_v32  ;;  %893 = vmatpush.bf16.msra.mxu1 %v2073_v36  ;;  %v1972_v32 = vld [vmem:[#allocation6 + $0x178] sm:$0xf]  ;;  %v2156_v36 = vld [vmem:[#allocation4 + $0x28] sm:$0xf]  ;;  %v2494_v21 = vld [vmem:[#allocation4 + $0x4] sm:$0xf] }
  0x93   :  { %1328 = vmatpush.bf16.msra.mxu2 %v2257_v37  ;;  %1347 = vmatpush.bf16.msra.mxu3 %v2417_v41  ;;  %v2501_v37 = vld [vmem:[#allocation4 + $0x38] sm:$0xf0]  ;;  %v1973_v39 = vor.u32 %v2623_v33, %v1972_v32  ;;  %v2514_v32 = vld [vmem:[#allocation4 + $0xa4] sm:$0xf]  ;;  %v2245_v33 = vor.u32 %v2522_v27, %v2244_v26 }
  0x94   :  { %v2541_v41 = vld [vmem:[#allocation4 + $0x178] sm:$0xf0] }
  0x96   :  { %875 = vmatpush.bf16.msra.mxu0 %v1893_v46  ;;  %894 = vmatpush.bf16.msra.mxu1 %v2053_v47  ;;  %v2157_v46 = vor.u32 %v2501_v37, %v2156_v36  ;;  %v2317_v47 = vor.u32 %v2541_v41, %v2316_v40  ;;  %v2554_v36 = vld [vmem:[#allocation4 + $0x1e4] sm:$0xf]  ;;  %v2378_v37 = vld [vmem:[#allocation4 + $0x1f4] sm:$0xf0]  ;;  %v2517_v41 = vld [vmem:[#allocation4 + $0xb8] sm:$0xf0] }
  0x97   :  { %1329 = vmatpush.bf16.msra.mxu2 %v2237_v51  ;;  %1348 = vmatpush.bf16.msra.mxu3 %v2397_v55  ;;  %v2496_v51 = vld [vmem:[#allocation4 + $0x10] sm:$0xf0]  ;;  %v2297_v55 = vor.u32 %v2536_v53, %v2296_v52  ;;  %v2381_v40 = vor.u32 %v2554_v36, %v2378_v37  ;;  %v2530_v36 = vld [vmem:[#allocation4 + $0x124] sm:$0xf]  ;;  %v2286_v37 = vld [vmem:[#allocation4 + $0x134] sm:$0xf0] }
  0x98   :  { %v2137_v54 = vor.u32 %v2496_v51, %v2136_v48  ;;  %v2549_v48 = vld [vmem:[#allocation4 + $0x1bc] sm:$0xf]  ;;  %v2204_v51 = vld [vmem:[#allocation4 + $0x80] sm:$0xf]  ;;  %v2512_v52 = vld [vmem:[#allocation4 + $0x90] sm:$0xf0] }
  0x9a   :  { %876 = vmatpush.bf16.msra.mxu0 %v1873_v59  ;;  %895 = vmatpush.bf16.msra.mxu1 %v2033_v60  ;;  %v2281_v59 = vor.u32 %v2529_v56, %v2278_v57  ;;  %v2438_v60 = vld [vmem:[#allocation4 + $0x26c] sm:$0xf0]  ;;  %v2504_v56 = vld [vmem:[#allocation4 + $0x54] sm:$0xf]  ;;  %v2205_v57 = vor.u32 %v2512_v52, %v2204_v51 }
  0x9b   :  { %1330 = vmatpush.bf16.msra.mxu2 %v2217_v23  ;;  %1349 = vmatpush.bf16.msra.mxu3 %v2377_v3  ;;  %v2441_v63 = vor.u32 %v2569_v58, %v2438_v60  ;;  %v2285_v23 = vor.u32 %v2532_v62, %v2284_v61  ;;  %v2444_v3 = vld [vmem:[#allocation4 + $0x260] sm:$0xf]  ;;  %v2544_v60 = vld [vmem:[#allocation4 + $0x194] sm:$0xf]  ;;  %v2338_v61 = vld [vmem:[#allocation4 + $0x1a4] sm:$0xf0] }
  0x9c   :  { %2097 = vmatmul.msk.bf16.gmra.mxu0 %vm2832_vm10, %v2722_v16  ;;  %2105 = vmatmul.msk.bf16.gmra.mxu2 %vm2832_vm10, %v2722_v16  ;;  %v2445_v5 = vor.u32 %v2572_v1, %v2444_v3  ;;  %v2507_v3 = vld [vmem:[#allocation4 + $0x68] sm:$0xf0]  ;;  %v2344_v1 = vld [vmem:[#allocation4 + $0x198] sm:$0xf]  ;;  %v2426_v51 = vld [vmem:[#allocation4 + $0x24c] sm:$0xf0] }
  0x9d   :  { %2101 = vmatmul.msk.bf16.gmra.mxu1 %vm2836_vm11, %v2722_v16  ;;  %2109 = vmatmul.msk.bf16.gmra.mxu3 %vm2836_vm11, %v2722_v16 }
  0x9e   :  { %877 = vmatpush.bf16.msra.mxu0 %v1853_v6  ;;  %896 = vmatpush.bf16.msra.mxu1 %v2013_v10  ;;  %v2258_v6 = vld [vmem:[#allocation4 + $0x104] sm:$0xf0]  ;;  %v2421_v10 = vor.u32 %v2564_v7, %v2418_v8  ;;  %v2539_v7 = vld [vmem:[#allocation4 + $0x16c] sm:$0xf]  ;;  %v2318_v8 = vld [vmem:[#allocation4 + $0x17c] sm:$0xf0] }
  0x9f   :  { %1331 = vmatpush.bf16.msra.mxu2 %v2197_v17  ;;  %1350 = vmatpush.bf16.msra.mxu3 %v2357_v19  ;;  %v2261_v9 = vor.u32 %v2524_v4, %v2258_v6  ;;  %v2265_v17 = vor.u32 %v2527_v13, %v2264_v11  ;;  %v2567_v19 = vld [vmem:[#allocation4 + $0x248] sm:$0xf0]  ;;  %v2158_v6 = vld [vmem:[#allocation4 + $0x3c] sm:$0xf0]  ;;  %v2164_v11 = vld [vmem:[#allocation4 + $0x30] sm:$0xf] }
  0xa0   :  { %v2425_v22 = vor.u32 %v2567_v19, %v2424_v14  ;;  %v2547_v4 = vld [vmem:[#allocation4 + $0x1a8] sm:$0xf0]  ;;  %v2502_v13 = vld [vmem:[#allocation4 + $0x40] sm:$0xf0]  ;;  %v2324_v19 = vld [vmem:[#allocation4 + $0x170] sm:$0xf] }
  0xa1   :  { %v2165_v26 = vor.u32 %v2502_v13, %v2164_v11  ;;  %v2325_v27 = vor.u32 %v2542_v20, %v2324_v19  ;;  %v2555_v11 = vld [vmem:[#allocation4 + $0x1ec] sm:$0xf]  ;;  %v2386_v13 = vld [vmem:[#allocation4 + $0x1fc] sm:$0xf0]  ;;  %v2518_v20 = vld [vmem:[#allocation4 + $0xc0] sm:$0xf0] }
  0xa2   :  { %878 = vmatpush.bf16.msra.mxu0 %v1833_v24  ;;  %897 = vmatpush.bf16.msra.mxu1 %v1993_v25  ;;  %v2559_v24 = vld [vmem:[#allocation4 + $0x20c] sm:$0xf]  ;;  %v2398_v25 = vld [vmem:[#allocation4 + $0x21c] sm:$0xf0]  ;;  %v2389_v19 = vor.u32 %v2555_v11, %v2386_v13 }
  0xa3   :  { %1332 = vmatpush.bf16.msra.mxu2 %v2177_v34  ;;  %1351 = vmatpush.bf16.msra.mxu3 %v2337_v35  ;;  %v2401_v31 = vor.u32 %v2559_v24, %v2398_v25  ;;  %v2405_v34 = vor.u32 %v2562_v29, %v2404_v28  ;;  %v2218_v35 = vld [vmem:[#allocation4 + $0xb4] sm:$0xf0]  ;;  %v2534_v24 = vld [vmem:[#allocation4 + $0x144] sm:$0xf]  ;;  %v2144_v28 = vld [vmem:[#allocation4 + $0x8] sm:$0xf] }
  0xa4   :  { %v2298_v25 = vld [vmem:[#allocation4 + $0x154] sm:$0xf0] }
  0xa6   :  { %879 = vmatpush.bf16.msra.mxu0 %v1813_v38  ;;  %898 = vmatpush.bf16.msra.mxu1 %v1973_v39  ;;  %v2224_v38 = vld [vmem:[#allocation4 + $0xa8] sm:$0xf]  ;;  %v2221_v39 = vor.u32 %v2514_v32, %v2218_v35 }
  0xa7   :  { %1333 = vmatpush.bf16.msra.mxu2 %v2157_v46  ;;  %1352 = vmatpush.bf16.msra.mxu3 %v2317_v47  ;;  %v2225_v44 = vor.u32 %v2517_v41, %v2224_v38  ;;  %v2509_v46 = vld [vmem:[#allocation4 + $0x7c] sm:$0xf]  ;;  %v2198_v47 = vld [vmem:[#allocation4 + $0x8c] sm:$0xf0]  ;;  %v2304_v32 = vld [vmem:[#allocation4 + $0x148] sm:$0xf] }
  0xa8   :  { %v2570_v38 = vld [vmem:[#allocation4 + $0x264] sm:$0xf]  ;;  %v2292_v41 = vld [vmem:[#allocation4 + $0x128] sm:$0xf] }
  0xaa   :  { %880 = vmatpush.bf16.msra.mxu0 %v1793_v49  ;;  %899 = vmatpush.bf16.msra.mxu1 %v1953_v50  ;;  %v2201_v49 = vor.u32 %v2509_v46, %v2198_v47  ;;  %v2358_v50 = vld [vmem:[#allocation4 + $0x1cc] sm:$0xf0]  ;;  %v2573_v46 = vld [vmem:[#allocation4 + $0x278] sm:$0xf0] }
  0xab   :  { %1334 = vmatpush.bf16.msra.mxu2 %v2137_v54  ;;  %1353 = vmatpush.bf16.msra.mxu3 %v2297_v55  ;;  %v2361_v53 = vor.u32 %v2549_v48, %v2358_v50  ;;  %v2364_v54 = vld [vmem:[#allocation4 + $0x1c0] sm:$0xf]  ;;  %v2552_v55 = vld [vmem:[#allocation4 + $0x1d0] sm:$0xf0]  ;;  %v2525_v47 = vld [vmem:[#allocation4 + $0xfc] sm:$0xf] }
  0xac   :  { %2111 = vmatmul.msk.bf16.vlgmr.msrb.gmra.mxu0 %vm2806_vm4, %v2722_v16  ;;  %2119 = vmatmul.msk.bf16.vlgmr.msrb.gmra.mxu2 %vm2806_vm4, %v2722_v16  ;;  %v2365_v58 = vor.u32 %v2552_v55, %v2364_v54  ;;  %v2565_v50 = vld [vmem:[#allocation4 + $0x23c] sm:$0xf]  ;;  %v2272_v54 = vld [vmem:[#allocation4 + $0x100] sm:$0xf]  ;;  %v2528_v55 = vld [vmem:[#allocation4 + $0x110] sm:$0xf0] }
  0xad   :  { %2115 = vmatmul.msk.bf16.vlgmr.msrb.gmra.mxu1 %vm2810_vm5, %v2722_v16  ;;  %2123 = vmatmul.msk.bf16.vlgmr.msrb.gmra.mxu3 %vm2810_vm5, %v2722_v16 }
  0xae   :  { %1365 = vmatpush.bf16.msrb.mxu0 %v2281_v59  ;;  %1384 = vmatpush.bf16.msrb.mxu1 %v2441_v63  ;;  %v2178_v59 = vld [vmem:[#allocation4 + $0x64] sm:$0xf0]  ;;  %v2341_v63 = vor.u32 %v2544_v60, %v2338_v61 }
  0xaf   :  { %1403 = vmatpush.bf16.msrb.mxu2 %v2285_v23  ;;  %1422 = vmatpush.bf16.msrb.mxu3 %v2445_v5  ;;  %v2181_v62 = vor.u32 %v2504_v56, %v2178_v59  ;;  %v2184_v23 = vld [vmem:[#allocation4 + $0x58] sm:$0xf]  ;;  %v2499_v5 = vld [vmem:[#allocation4 + $0x2c] sm:$0xf]  ;;  %v2432_v56 = vld [vmem:[#allocation4 + $0x240] sm:$0xf] }
  0xb0   :  { %v2161_v14 = vor.u32 %v2499_v5, %v2158_v6  ;;  %v2520_v59 = vld [vmem:[#allocation4 + $0xd4] sm:$0xf]  ;;  %v2246_v60 = vld [vmem:[#allocation4 + $0xe4] sm:$0xf0] }
  0xb1   :  { %v2249_v5 = vor.u32 %v2520_v59, %v2246_v60  ;;  %v2543_v59 = vld [vmem:[#allocation4 + $0x188] sm:$0xf0] }
  0xb2   :  { %1366 = vmatpush.bf16.msrb.mxu0 %v2261_v9  ;;  %1385 = vmatpush.bf16.msrb.mxu1 %v2421_v10  ;;  %v2185_v9 = vor.u32 %v2507_v3, %v2184_v23  ;;  %v2345_v10 = vor.u32 %v2547_v4, %v2344_v1  ;;  %v2252_v23 = vld [vmem:[#allocation4 + $0xd8] sm:$0xf]  ;;  %v2523_v3 = vld [vmem:[#allocation4 + $0xe8] sm:$0xf0] }
  0xb3   :  { %1404 = vmatpush.bf16.msrb.mxu2 %v2265_v17  ;;  %1423 = vmatpush.bf16.msrb.mxu3 %v2425_v22  ;;  %v2321_v17 = vor.u32 %v2539_v7, %v2318_v8  ;;  %v2138_v22 = vld [vmem:[#allocation4 + $0x14] sm:$0xf0]  ;;  %v2563_v4 = vld [vmem:[#allocation4 + $0x228] sm:$0xf0]  ;;  %v2253_v8 = vor.u32 %v2523_v3, %v2252_v23 }
  0xb4   :  { %v2141_v29 = vor.u32 %v2494_v21, %v2138_v22  ;;  %v2412_v1 = vld [vmem:[#allocation4 + $0x218] sm:$0xf]  ;;  %v2515_v7 = vld [vmem:[#allocation4 + $0xac] sm:$0xf]  ;;  %v2392_v21 = vld [vmem:[#allocation4 + $0x1f0] sm:$0xf] }
  0xb5   :  { %v2558_v22 = vld [vmem:[#allocation4 + $0x200] sm:$0xf0]  ;;  %v2495_v60 = vld [vmem:[#allocation4 + $0xc] sm:$0xf] }
  0xb6   :  { %1367 = vmatpush.bf16.msrb.mxu0 %v2241_v30  ;;  %1386 = vmatpush.bf16.msrb.mxu1 %v2401_v31  ;;  %v2301_v30 = vor.u32 %v2534_v24, %v2298_v25  ;;  %v2497_v31 = vld [vmem:[#allocation4 + $0x18] sm:$0xf0]  ;;  %v2393_v25 = vor.u32 %v2558_v22, %v2392_v21  ;;  %v2535_v3 = vld [vmem:[#allocation4 + $0x14c] sm:$0xf] }
  0xb7   :  { %1405 = vmatpush.bf16.msrb.mxu2 %v2245_v33  ;;  %1424 = vmatpush.bf16.msrb.mxu3 %v2405_v34  ;;  %v2537_v33 = vld [vmem:[#allocation4 + $0x158] sm:$0xf0]  ;;  %v2145_v34 = vor.u32 %v2497_v31, %v2144_v28  ;;  %v2550_v28 = vld [vmem:[#allocation4 + $0x1c4] sm:$0xf]  ;;  %v2212_v31 = vld [vmem:[#allocation4 + $0x88] sm:$0xf] }
  0xb8   :  { %v2305_v35 = vor.u32 %v2537_v33, %v2304_v32  ;;  %v2513_v32 = vld [vmem:[#allocation4 + $0x98] sm:$0xf0] }
  0xba   :  { %1368 = vmatpush.bf16.msrb.mxu0 %v2221_v39  ;;  %1387 = vmatpush.bf16.msrb.mxu1 %v2381_v40  ;;  %v2289_v39 = vor.u32 %v2530_v36, %v2286_v37  ;;  %v2446_v40 = vld [vmem:[#allocation4 + $0x274] sm:$0xf0]  ;;  %v2505_v36 = vld [vmem:[#allocation4 + $0x5c] sm:$0xf]  ;;  %v2213_v37 = vor.u32 %v2513_v32, %v2212_v31 }
  0xbb   :  { %1406 = vmatpush.bf16.msrb.mxu2 %v2225_v44  ;;  %1425 = vmatpush.bf16.msrb.mxu3 %v2385_v45  ;;  %v2449_v43 = vor.u32 %v2570_v38, %v2446_v40  ;;  %v2293_v44 = vor.u32 %v2533_v42, %v2292_v41  ;;  %v2452_v45 = vld [vmem:[#allocation4 + $0x268] sm:$0xf]  ;;  %v2545_v40 = vld [vmem:[#allocation4 + $0x19c] sm:$0xf]  ;;  %v2346_v41 = vld [vmem:[#allocation4 + $0x1ac] sm:$0xf0] }
  0xbc   :  { %2113 = vmatmul.msk.bf16.gmra.mxu0 %vm2832_vm10, %v2722_v16  ;;  %2121 = vmatmul.msk.bf16.gmra.mxu2 %vm2832_vm10, %v2722_v16  ;;  %v2453_v48 = vor.u32 %v2573_v46, %v2452_v45  ;;  %v2508_v45 = vld [vmem:[#allocation4 + $0x70] sm:$0xf0]  ;;  %v2352_v46 = vld [vmem:[#allocation4 + $0x1a0] sm:$0xf] }
  0xbd   :  { %2117 = vmatmul.msk.bf16.gmra.mxu1 %vm2836_vm11, %v2722_v16  ;;  %2125 = vmatmul.msk.bf16.gmra.mxu3 %vm2836_vm11, %v2722_v16 }
  0xbe   :  { %1369 = vmatpush.bf16.msrb.mxu0 %v2201_v49  ;;  %1388 = vmatpush.bf16.msrb.mxu1 %v2361_v53  ;;  %v2266_v49 = vld [vmem:[#allocation4 + $0x10c] sm:$0xf0]  ;;  %v2429_v53 = vor.u32 %v2565_v50, %v2426_v51  ;;  %v2540_v50 = vld [vmem:[#allocation4 + $0x174] sm:$0xf]  ;;  %v2326_v51 = vld [vmem:[#allocation4 + $0x184] sm:$0xf0] }
  0xbf   :  { %1407 = vmatpush.bf16.msrb.mxu2 %v2205_v57  ;;  %1426 = vmatpush.bf16.msrb.mxu3 %v2365_v58  ;;  %v2269_v52 = vor.u32 %v2525_v47, %v2266_v49  ;;  %v2273_v57 = vor.u32 %v2528_v55, %v2272_v54  ;;  %v2568_v58 = vld [vmem:[#allocation4 + $0x250] sm:$0xf0]  ;;  %v2166_v49 = vld [vmem:[#allocation4 + $0x44] sm:$0xf0]  ;;  %v2172_v54 = vld [vmem:[#allocation4 + $0x38] sm:$0xf] }
  0xc0   :  { %v2433_v61 = vor.u32 %v2568_v58, %v2432_v56  ;;  %v2548_v47 = vld [vmem:[#allocation4 + $0x1b0] sm:$0xf0]  ;;  %v2329_v56 = vor.u32 %v2540_v50, %v2326_v51  ;;  %v2332_v58 = vld [vmem:[#allocation4 + $0x178] sm:$0xf] }
  0xc2   :  { %1370 = vmatpush.bf16.msrb.mxu0 %v2181_v62  ;;  %1389 = vmatpush.bf16.msrb.mxu1 %v2341_v63  ;;  %v2560_v62 = vld [vmem:[#allocation4 + $0x214] sm:$0xf]  ;;  %v2406_v63 = vld [vmem:[#allocation4 + $0x224] sm:$0xf0] }
  0xc3   :  { %1408 = vmatpush.bf16.msrb.mxu2 %v2185_v9  ;;  %1427 = vmatpush.bf16.msrb.mxu3 %v2345_v10  ;;  %v2409_v6 = vor.u32 %v2560_v62, %v2406_v63  ;;  %v2413_v9 = vor.u32 %v2563_v4, %v2412_v1  ;;  %v2226_v10 = vld [vmem:[#allocation4 + $0xbc] sm:$0xf0]  ;;  %v2333_v63 = vor.u32 %v2543_v59, %v2332_v58  ;;  %v2152_v4 = vld [vmem:[#allocation4 + $0x10] sm:$0xf] }
  0xc4   :  { %v2306_v1 = vld [vmem:[#allocation4 + $0x15c] sm:$0xf0] }
  0xc6   :  { %1371 = vmatpush.bf16.msrb.mxu0 %v2161_v14  ;;  %1390 = vmatpush.bf16.msrb.mxu1 %v2321_v17  ;;  %v2232_v14 = vld [vmem:[#allocation4 + $0xb0] sm:$0xf]  ;;  %v2229_v17 = vor.u32 %v2515_v7, %v2226_v10 }
  0xc7   :  { %1409 = vmatpush.bf16.msrb.mxu2 %v2165_v26  ;;  %1428 = vmatpush.bf16.msrb.mxu3 %v2325_v27  ;;  %v2233_v24 = vor.u32 %v2518_v20, %v2232_v14  ;;  %v2510_v26 = vld [vmem:[#allocation4 + $0x84] sm:$0xf]  ;;  %v2206_v27 = vld [vmem:[#allocation4 + $0x94] sm:$0xf0]  ;;  %v2312_v7 = vld [vmem:[#allocation4 + $0x150] sm:$0xf] }
  0xca   :  { %1372 = vmatpush.bf16.msrb.mxu0 %v2141_v29  ;;  %1391 = vmatpush.bf16.msrb.mxu1 %v2301_v30  ;;  %v2209_v29 = vor.u32 %v2510_v26, %v2206_v27  ;;  %v2366_v30 = vld [vmem:[#allocation4 + $0x1d4] sm:$0xf0] }
  0xcb   :  { %1410 = vmatpush.bf16.msrb.mxu2 %v2145_v34  ;;  %1429 = vmatpush.bf16.msrb.mxu3 %v2305_v35  ;;  %v2369_v33 = vor.u32 %v2550_v28, %v2366_v30  ;;  %v2372_v34 = vld [vmem:[#allocation4 + $0x1c8] sm:$0xf]  ;;  %v2553_v35 = vld [vmem:[#allocation4 + $0x1d8] sm:$0xf0] }
  0xcc   :  { %2127 = vmatmul.msk.bf16.vlgmr.msra.gmra.mxu0 %vm2806_vm4, %v2722_v16  ;;  %2455 = vmatmul.msk.bf16.vlgmr.msra.gmra.mxu2 %vm2806_vm4, %v2722_v16  ;;  %v2373_v38 = vor.u32 %v2553_v35, %v2372_v34 }
  0xcd   :  { %2131 = vmatmul.msk.bf16.vlgmr.msra.gmra.mxu1 %vm2810_vm5, %v2722_v16  ;;  %2459 = vmatmul.msk.bf16.vlgmr.msra.gmra.mxu3 %vm2810_vm5, %v2722_v16 }
  0xce   :  { %1441 = vmatpush.bf16.msra.mxu0 %v2289_v39  ;;  %1460 = vmatpush.bf16.msra.mxu1 %v2449_v43  ;;  %v2186_v39 = vld [vmem:[#allocation4 + $0x6c] sm:$0xf0]  ;;  %v2349_v43 = vor.u32 %v2545_v40, %v2346_v41 }
  0xcf   :  { %1479 = vmatpush.bf16.msra.mxu2 %v2293_v44  ;;  %1498 = vmatpush.bf16.msra.mxu3 %v2453_v48  ;;  %v2189_v42 = vor.u32 %v2505_v36, %v2186_v39  ;;  %v2192_v44 = vld [vmem:[#allocation4 + $0x60] sm:$0xf]  ;;  %v2500_v48 = vld [vmem:[#allocation4 + $0x34] sm:$0xf] }
  0xd0   :  { %v2169_v55 = vor.u32 %v2500_v48, %v2166_v49 }
  0xd2   :  { %1442 = vmatpush.bf16.msra.mxu0 %v2269_v52  ;;  %1461 = vmatpush.bf16.msra.mxu1 %v2429_v53  ;;  %v2193_v52 = vor.u32 %v2508_v45, %v2192_v44  ;;  %v2353_v53 = vor.u32 %v2548_v47, %v2352_v46 }
  0xd3   :  { %1480 = vmatpush.bf16.msra.mxu2 %v2273_v57  ;;  %1499 = vmatpush.bf16.msra.mxu3 %v2433_v61  ;;  %v2503_v57 = vld [vmem:[#allocation4 + $0x48] sm:$0xf0]  ;;  %v2146_v61 = vld [vmem:[#allocation4 + $0x1c] sm:$0xf0] }
  0xd4   :  { %v2173_v62 = vor.u32 %v2503_v57, %v2172_v54  ;;  %v2149_v23 = vor.u32 %v2495_v60, %v2146_v61 }
  0xd6   :  { %1443 = vmatpush.bf16.msra.mxu0 %v2249_v5  ;;  %1462 = vmatpush.bf16.msra.mxu1 %v2409_v6  ;;  %v2309_v5 = vor.u32 %v2535_v3, %v2306_v1  ;;  %v2498_v6 = vld [vmem:[#allocation4 + $0x20] sm:$0xf0] }
  0xd7   :  { %1481 = vmatpush.bf16.msra.mxu2 %v2253_v8  ;;  %1500 = vmatpush.bf16.msra.mxu3 %v2413_v9  ;;  %v2538_v8 = vld [vmem:[#allocation4 + $0x160] sm:$0xf0]  ;;  %v2153_v9 = vor.u32 %v2498_v6, %v2152_v4 }
  0xd8   :  { %v2313_v10 = vor.u32 %v2538_v8, %v2312_v7 }
  0xda   :  { %1444 = vmatpush.bf16.msra.mxu0 %v2229_v17  ;;  %1463 = vmatpush.bf16.msra.mxu1 %v2389_v19 }
  0xdb   :  { %1482 = vmatpush.bf16.msra.mxu2 %v2233_v24  ;;  %1501 = vmatpush.bf16.msra.mxu3 %v2393_v25 }
  0xdc   :  { %2129 = vmatmul.msk.bf16.gmra.mxu0 %vm2832_vm10, %v2722_v16  ;;  %2457 = vmatmul.msk.bf16.gmra.mxu2 %vm2832_vm10, %v2722_v16 }
  0xdd   :  { %2133 = vmatmul.msk.bf16.gmra.mxu1 %vm2836_vm11, %v2722_v16  ;;  %2461 = vmatmul.msk.bf16.gmra.mxu3 %vm2836_vm11, %v2722_v16 }
  0xde   :  { %1445 = vmatpush.bf16.msra.mxu0 %v2209_v29  ;;  %1464 = vmatpush.bf16.msra.mxu1 %v2369_v33 }
  0xdf   :  { %1483 = vmatpush.bf16.msra.mxu2 %v2213_v37  ;;  %1502 = vmatpush.bf16.msra.mxu3 %v2373_v38 }
  0xe2   :  { %1446 = vmatpush.bf16.msra.mxu0 %v2189_v42  ;;  %1465 = vmatpush.bf16.msra.mxu1 %v2349_v43 }
  0xe3   :  { %1484 = vmatpush.bf16.msra.mxu2 %v2193_v52  ;;  %1503 = vmatpush.bf16.msra.mxu3 %v2353_v53 }
  0xe6   :  { %1447 = vmatpush.bf16.msra.mxu0 %v2169_v55  ;;  %1466 = vmatpush.bf16.msra.mxu1 %v2329_v56 }
  0xe7   :  { %1485 = vmatpush.bf16.msra.mxu2 %v2173_v62  ;;  %1504 = vmatpush.bf16.msra.mxu3 %v2333_v63 }
  0xea   :  { %1448 = vmatpush.bf16.msra.mxu0 %v2149_v23  ;;  %1467 = vmatpush.bf16.msra.mxu1 %v2309_v5 }
  0xeb   :  { %1486 = vmatpush.bf16.msra.mxu2 %v2153_v9  ;;  %1505 = vmatpush.bf16.msra.mxu3 %v2313_v10 }
  0xec   :  { %2463 = vmatmul.msk.bf16.vlgmr.msrb.gmra.mxu0 %vm2806_vm4, %v2722_v16  ;;  %2471 = vmatmul.msk.bf16.vlgmr.msrb.gmra.mxu2 %vm2806_vm4, %v2722_v16 }
  0xed   :  { %2467 = vmatmul.msk.bf16.vlgmr.msrb.gmra.mxu1 %vm2810_vm5, %v2722_v16  ;;  %2475 = vmatmul.msk.bf16.vlgmr.msrb.gmra.mxu3 %vm2810_vm5, %v2722_v16 }
  0xfc   :  { %2465 = vmatmul.msk.bf16.gmra.mxu0 %vm2832_vm10, %v2722_v16  ;;  %2473 = vmatmul.msk.bf16.gmra.mxu2 %vm2832_vm10, %v2722_v16 }
  0xfd   :  { %2469 = vmatmul.msk.bf16.gmra.mxu1 %vm2836_vm11, %v2722_v16  ;;  %2477 = vmatmul.msk.bf16.gmra.mxu3 %vm2836_vm11, %v2722_v16 }
 0x109   :  { %v730_v11 = vpop.f32.mrf.mxu0 }
 0x10a   :  { %v749_v13 = vpop.f32.mrf.mxu1 }
 0x10b   :  { %v750_v14 = vadd.f32 %v749_v13, %v730_v11 }
 0x10c   :  { %2479 = vmatmul.msk.bf16.vlgmr.msra.gmra.mxu0 %vm2806_vm4, %v2722_v16  ;;  %2487 = vmatmul.msk.bf16.vlgmr.msra.gmra.mxu2 %vm2806_vm4, %v2722_v16 }
 0x10d   :  { %2483 = vmatmul.msk.bf16.vlgmr.msra.gmra.mxu1 %vm2810_vm5, %v2722_v16  ;;  %2491 = vmatmul.msk.bf16.vlgmr.msra.gmra.mxu3 %vm2810_vm5, %v2722_v16 }
 0x10f   :  { %v768_v17 = vpop.f32.mrf.mxu2 }
 0x110   :  { %v787_v19 = vpop.f32.mrf.mxu3 }
 0x111   :  { %v2936_v20 = vadd.f32 %v787_v19, %v768_v17  ;;  %v732_v21 = vpop.f32.mrf.mxu0 }
 0x112   :  { %v751_v22 = vpop.f32.mrf.mxu1 }
 0x113   :  { %v752_v24 = vadd.f32 %v751_v22, %v732_v21 }
 0x117   :  { %v770_v25 = vpop.f32.mrf.mxu2 }
 0x118   :  { %v789_v26 = vpop.f32.mrf.mxu3 }
 0x119   :  { %v2938_v27 = vadd.f32 %v789_v26, %v770_v25  ;;  %v735_v12 = vpop.f32.mrf.mxu0 }
 0x11a   :  { %v754_v28 = vpop.f32.mrf.mxu1 }
 0x11b   :  { %v755_v29 = vadd.f32 %v754_v28, %v735_v12 }
 0x11c   :  { %2481 = vmatmul.msk.bf16.gmra.mxu0 %vm2832_vm10, %v2722_v16  ;;  %2489 = vmatmul.msk.bf16.gmra.mxu2 %vm2832_vm10, %v2722_v16 }
 0x11d   :  { %2485 = vmatmul.msk.bf16.gmra.mxu1 %vm2836_vm11, %v2722_v16  ;;  %2493 = vmatmul.msk.bf16.gmra.mxu3 %vm2836_vm11, %v2722_v16 }
 0x11f   :  { %v773_v15 = vpop.f32.mrf.mxu2 }
 0x120   :  { %v792_v30 = vpop.f32.mrf.mxu3 }
 0x121   :  { %v2952_v31 = vadd.f32 %v792_v30, %v773_v15  ;;  %v737_v32 = vpop.f32.mrf.mxu0 }
 0x122   :  { %v756_v33 = vpop.f32.mrf.mxu1 }
 0x123   :  { %v757_v34 = vadd.f32 %v756_v33, %v737_v32 }
 0x127   :  { %v775_v35 = vpop.f32.mrf.mxu2 }
 0x128   :  { %v794_v36 = vpop.f32.mrf.mxu3 }
 0x129   :  { %v2954_v37 = vadd.f32 %v794_v36, %v775_v35  ;;  %v806_v0 = vpop.f32.mrf.mxu0 }
 0x12a   :  { %v825_v38 = vpop.f32.mrf.mxu1 }
 0x12b   :  { %v826_v39 = vadd.f32 %v825_v38, %v806_v0 }
 0x12f   :  { %v844_v40 = vpop.f32.mrf.mxu2 }
 0x130   :  { %v863_v41 = vpop.f32.mrf.mxu3 }
 0x131   :  { %v2956_v42 = vadd.f32 %v863_v41, %v844_v40  ;;  %v808_v2 = vpop.f32.mrf.mxu0 }
 0x132   :  { %v827_v16 = vpop.f32.mrf.mxu1 }
 0x133   :  { %v2958_v43 = vadd.f32 %v827_v16, %v808_v2 }
 0x137   :  { %v846_v44 = vpop.f32.mrf.mxu2 }
 0x138   :  { %v865_v45 = vpop.f32.mrf.mxu3 }
 0x139   :  { %v2960_v46 = vadd.f32 %v865_v45, %v846_v44  ;;  %v811_v47 = vpop.f32.mrf.mxu0 }
 0x13a   :  { %v830_v48 = vpop.f32.mrf.mxu1 }
 0x13b   :  { %v2962_v49 = vadd.f32 %v830_v48, %v811_v47 }
 0x13f   :  { %v849_v50 = vpop.f32.mrf.mxu2 }
 0x140   :  { %v868_v51 = vpop.f32.mrf.mxu3 }
 0x141   :  { %v2964_v52 = vadd.f32 %v868_v51, %v849_v50  ;;  %v813_v53 = vpop.f32.mrf.mxu0 }
 0x142   :  { %v832_v54 = vpop.f32.mrf.mxu1 }
 0x143   :  { %v2966_v55 = vadd.f32 %v832_v54, %v813_v53 }
 0x147   :  { %v851_v56 = vpop.f32.mrf.mxu2 }
 0x148   :  { %v870_v57 = vpop.f32.mrf.mxu3 }
 0x149   :  { %v2968_v58 = vadd.f32 %v870_v57, %v851_v56  ;;  %v882_v59 = vpop.f32.mrf.mxu0 }
 0x14a   :  { %v901_v60 = vpop.f32.mrf.mxu1 }
 0x14b   :  { %v2970_v61 = vadd.f32 %v901_v60, %v882_v59 }
 0x14f   :  { %v1336_v62 = vpop.f32.mrf.mxu2 }
 0x150   :  { %v1337_v63 = vadd.f32 %v1336_v62, %v750_v14  ;;  %v1355_v23 = vpop.f32.mrf.mxu3 }
 0x151   :  { %v884_v3 = vpop.f32.mrf.mxu0 }
 0x152   :  { %v1356_v1 = vadd.f32 %v1355_v23, %v1337_v63  ;;  %v903_v4 = vpop.f32.mrf.mxu1 }
 0x153   :  { %v2972_v5 = vadd.f32 %v903_v4, %v884_v3 }
 0x157   :  { %v1338_v6 = vpop.f32.mrf.mxu2 }
 0x158   :  { %v1339_v7 = vadd.f32 %v1338_v6, %v752_v24  ;;  %v1357_v8 = vpop.f32.mrf.mxu3 }
 0x159   :  { %v887_v9 = vpop.f32.mrf.mxu0 }
 0x15a   :  { %v1358_v10 = vadd.f32 %v1357_v8, %v1339_v7  ;;  %v906_v11 = vpop.f32.mrf.mxu1 }
 0x15b   :  { %v2974_v13 = vadd.f32 %v906_v11, %v887_v9 }
 0x15f   :  { %v1341_v17 = vpop.f32.mrf.mxu2 }
 0x160   :  { %v1342_v19 = vadd.f32 %v1341_v17, %v755_v29  ;;  %v1360_v21 = vpop.f32.mrf.mxu3 }
 0x161   :  { %v889_v22 = vpop.f32.mrf.mxu0 }
 0x162   :  { %v1361_v25 = vadd.f32 %v1360_v21, %v1342_v19  ;;  %v908_v14 = vpop.f32.mrf.mxu1 }
 0x163   :  { %v2976_v26 = vadd.f32 %v908_v14, %v889_v22 }
 0x167   :  { %v1343_v12 = vpop.f32.mrf.mxu2 }
 0x168   :  { %v1344_v28 = vadd.f32 %v1343_v12, %v757_v34  ;;  %v1362_v15 = vpop.f32.mrf.mxu3 }
 0x169   :  { %v1374_v30 = vpop.f32.mrf.mxu0 }
 0x16a   :  { %v1363_v32 = vadd.f32 %v1362_v15, %v1344_v28  ;;  %v1393_v24 = vpop.f32.mrf.mxu1  ;;  %v1375_v33 = vadd.f32 %v1374_v30, %v2936_v20 }
 0x16c   :  { %1520 = vst [vmem:[#allocation2 + $0x8] sm:$0xff] %v1363_v32  ;;  %v1394_v38 = vadd.f32 %v1393_v24, %v1375_v33 }
 0x16e   :  { %v1530_v16 = vrot.slane %v1394_v38, 1 }
 0x16f   :  { %v1412_v35 = vpop.f32.mrf.mxu2 }
 0x170   :  { %v1431_v36 = vpop.f32.mrf.mxu3  ;;  %v1413_v41 = vadd.f32 %v1412_v35, %v826_v39 }
 0x171   :  { %v1376_v0 = vpop.f32.mrf.mxu0 }
 0x172   :  { %v1377_v29 = vadd.f32 %v1376_v0, %v2938_v27  ;;  %v1395_v40 = vpop.f32.mrf.mxu1  ;;  %v1432_v45 = vadd.f32 %v1431_v36, %v1413_v41 }
 0x173   :  { %v1524_v21 = vld [vmem:[#allocation2 + $0x8] sm:$0x7f] }
 0x174   :  { %v1396_v2 = vadd.f32 %v1395_v40, %v1377_v29  ;;  %v1558_v27 = vrot.slane %v1432_v45, 2 }
 0x176   :  { %v1531_v44 = vrot.slane %v1396_v2, 1  ;;  %v1686_v2 = vld [vmem:[%s3143_s5 + $0x78] sm:$0xff] }
 0x177   :  { %v1414_v34 = vpop.f32.mrf.mxu2  ;;  %1697 = vmatpush.msrb.mxu0 %v1686_v2 }
 0x178   :  { %v1532_v47 = vsel %vm1529_vm12, %v1530_v16, %v1531_v44  ;;  %v1415_v48 = vadd.f32 %v1414_v34, %v2958_v43  ;;  %v1433_v50 = vpop.f32.mrf.mxu3  ;;  %v1637_v16 = vld [vmem:[%s3141_s3] sm:$0x1]  ;;  %v1685_v34 = vld [vmem:[%s3143_s5 + $0x70] sm:$0xff] }
 0x179   :  { %v1541_v20 = vadd.f32 %v1532_v47, %v1356_v1  ;;  %v1379_v51 = vpop.f32.mrf.mxu0  ;;  %1698 = vmatpush.msrb.mxu0 %v1685_v34  ;;  %v1671_v34 = vld [vmem:[%s3143_s5] sm:$0xff] }
 0x17a   :  { %v1434_v53 = vadd.f32 %v1433_v50, %v1415_v48  ;;  %v1380_v54 = vadd.f32 %v1379_v51, %v2952_v31  ;;  %v1398_v56 = vpop.f32.mrf.mxu1  ;;  %v1638_v48 = vsub.s32 16, %v1637_v16  ;;  %v1673_v16 = vld [vmem:[%s3143_s5 + $0x10] sm:$0xff] }
 0x17c   :  { %v1559_v39 = vrot.slane %v1434_v53, 2  ;;  %v1399_v57 = vadd.f32 %v1398_v56, %v1380_v54 }
 0x17e   :  { %v1560_v59 = vsel %vm1557_vm13, %v1558_v27, %v1559_v39  ;;  %v1533_v60 = vrot.slane %v1399_v57, 1  ;;  %v3019_v57 = vshrl.u32 %v70_v18, 7  ;;  %v1680_v18 = vld [vmem:[%s3143_s5 + $0x48] sm:$0xff] }
 0x17f   :  { %v1569_v62 = vadd.f32 %v1560_v59, %v1541_v20  ;;  %v1417_v63 = vpop.f32.mrf.mxu2 }
 0x180   :  { %v1534_v23 = vsel %vm1529_vm12, %v1531_v44, %v1533_v60  ;;  %v1418_v43 = vadd.f32 %v1417_v63, %v2962_v49  ;;  %v1436_v3 = vpop.f32.mrf.mxu3 }
 0x181   :  { %v1542_v1 = vadd.f32 %v1534_v23, %v1358_v10  ;;  %v1381_v4 = vpop.f32.mrf.mxu0  ;;  %v3022_v23 = vperm.slane %v1638_v48, 0  ;;  %v1733_v48 = vld [vmem:[%s3145_s7 + $0x78] sm:$0xff] }
 0x182   :  { %v1437_v6 = vadd.f32 %v1436_v3, %v1418_v43  ;;  %v1382_v31 = vadd.f32 %v1381_v4, %v2954_v37  ;;  %v1400_v7 = vpop.f32.mrf.mxu1  ;;  %1738 = vmatpush.msrb.mxu1 %v1733_v48 }
 0x183   :  { %vm1643_vm0 = vcmp.le.s32.totalorder %v3019_v57, %v3022_v23 }
 0x184   :  { %v1561_v8 = vrot.slane %v1437_v6, 2  ;;  %v1401_v9 = vadd.f32 %v1400_v7, %v1382_v31  ;;  %v1679_v31 = vld [vmem:[%s3143_s5 + $0x40] sm:$0xff] }
 0x186   :  { %v1562_v11 = vsel %vm1557_vm13, %v1559_v39, %v1561_v8  ;;  %v1535_v17 = vrot.slane %v1401_v9, 1  ;;  %v1682_v39 = vld [vmem:[%s3143_s5 + $0x58] sm:$0xff] }
 0x187   :  { %v2988_v19 = vadd.f32 %v1562_v11, %v1542_v1  ;;  %v1419_v22 = vpop.f32.mrf.mxu2 }
 0x188   :  { %v1536_v14 = vsel %vm1529_vm12, %v1533_v60, %v1535_v17  ;;  %v1544_v12 = vadd.f32 %v1535_v17, %v1524_v21  ;;  %v1420_v49 = vadd.f32 %v1419_v22, %v2966_v55  ;;  %v1438_v10 = vpop.f32.mrf.mxu3  ;;  %v1678_v21 = vld [vmem:[%s3143_s5 + $0x38] sm:$0xff] }
 0x189   :  { %v1543_v28 = vadd.f32 %v1536_v14, %v1361_v25  ;;  %v1450_v15 = vpop.f32.mrf.mxu0  ;;  %v1641_v14 = vadd.s32 8, %v3019_v57 }
 0x18a   :  { %1548 = vst [vmem:[#allocation2 + $0x8] sm:$0x7f] %v1544_v12  ;;  %v1439_v37 = vadd.f32 %v1438_v10, %v1420_v49  ;;  %v1469_v30 = vpop.f32.mrf.mxu1  ;;  %v1451_v33 = vadd.f32 %v1450_v15, %v2956_v42  ;;  %v1676_v15 = vld [vmem:[%s3143_s5 + $0x28] sm:$0xff] }
 0x18b   :  { %vm1644_vm1 = vcmp.le.s32.totalorder %v1641_v14, %v3022_v23  ;;  %v1724_v23 = vld [vmem:[%s3145_s7 + $0x30] sm:$0xff] }
 0x18c   :  { %v1563_v32 = vrot.slane %v1439_v37, 2  ;;  %v1470_v41 = vadd.f32 %v1469_v30, %v1451_v33  ;;  %v1675_v33 = vld [vmem:[%s3143_s5 + $0x20] sm:$0xff] }
 0x18e   :  { %v1564_v24 = vsel %vm1557_vm13, %v1561_v8, %v1563_v32  ;;  %v1586_v45 = vrot.slane %v1470_v41, 3  ;;  %v1674_v41 = vld [vmem:[%s3143_s5 + $0x18] sm:$0xff] }
 0x18f   :  { %v2994_v35 = vadd.f32 %v1564_v24, %v1543_v28  ;;  %v1488_v36 = vpop.f32.mrf.mxu2 }
 0x190   :  { %v1507_v0 = vpop.f32.mrf.mxu3  ;;  %v1489_v42 = vadd.f32 %v1488_v36, %v2970_v61  ;;  %v1683_v61 = vld [vmem:[%s3143_s5 + $0x60] sm:$0xff] }
 0x191   :  { %v1552_v38 = vld [vmem:[#allocation2 + $0x8] sm:$0x3f]  ;;  %v1452_v29 = vpop.f32.mrf.mxu0 }
 0x192   :  { %v1572_v40 = vadd.f32 %v1563_v32, %v1552_v38  ;;  %v1453_v55 = vadd.f32 %v1452_v29, %v2960_v46  ;;  %v1471_v25 = vpop.f32.mrf.mxu1  ;;  %v1684_v46 = vld [vmem:[%s3143_s5 + $0x68] sm:$0xff]  ;;  %v1508_v20 = vadd.f32 %v1507_v0, %v1489_v42 }
 0x193   :  { %1699 = vmatpush.msrb.mxu0 %v1684_v46 }
 0x194   :  { %1576 = vst [vmem:[#allocation2 + $0x8] sm:$0x3f] %v1572_v40  ;;  %v1472_v44 = vadd.f32 %v1471_v25, %v1453_v55 }
 0x195   :  { %1700 = vmatpush.msrb.mxu0 %v1683_v61 }
 0x196   :  { %v1587_v47 = vrot.slane %v1472_v44, 3 }
 0x197   :  { %v1490_v50 = vpop.f32.mrf.mxu2  ;;  %1701 = vmatpush.msrb.mxu0 %v1682_v39 }
 0x198   :  { %v1588_v51 = vsel %vm1585_vm14, %v1586_v45, %v1587_v47  ;;  %v1491_v53 = vadd.f32 %v1490_v50, %v2972_v5  ;;  %v1509_v54 = vpop.f32.mrf.mxu3  ;;  %v1681_v5 = vld [vmem:[%s3143_s5 + $0x50] sm:$0xff] }
 0x199   :  { %v1597_v56 = vadd.f32 %v1588_v51, %v1569_v62  ;;  %v1455_v27 = vpop.f32.mrf.mxu0  ;;  %v1614_v62 = vrot.slane %v1508_v20, 4  ;;  %1702 = vmatpush.msrb.mxu0 %v1681_v5  ;;  %v1732_v50 = vld [vmem:[%s3145_s7 + $0x70] sm:$0xff]  ;;  %v1731_v20 = vld [vmem:[%s3145_s7 + $0x68] sm:$0xff]  ;;  %v1730_v51 = vld [vmem:[%s3145_s7 + $0x60] sm:$0xff] }
 0x19a   :  { %v1510_v59 = vadd.f32 %v1509_v54, %v1491_v53  ;;  %v1456_v60 = vadd.f32 %v1455_v27, %v2964_v52  ;;  %v1474_v63 = vpop.f32.mrf.mxu1  ;;  %1739 = vmatpush.msrb.mxu1 %v1732_v50  ;;  %v1729_v54 = vld [vmem:[%s3145_s7 + $0x58] sm:$0xff] }
 0x19b   :  { %1703 = vmatpush.msrb.mxu0 %v1680_v18  ;;  %v1580_v32 = vld [vmem:[#allocation2 + $0x8] sm:$0x1f] }
 0x19c   :  { %v1615_v43 = vrot.slane %v1510_v59, 4  ;;  %v1475_v3 = vadd.f32 %v1474_v63, %v1456_v60  ;;  %1740 = vmatpush.msrb.mxu1 %v1731_v20  ;;  %v1727_v59 = vld [vmem:[%s3145_s7 + $0x48] sm:$0xff]  ;;  %v1726_v63 = vld [vmem:[%s3145_s7 + $0x40] sm:$0xff] }
 0x19d   :  { %1704 = vmatpush.msrb.mxu0 %v1679_v31 }
 0x19e   :  { %v1616_v1 = vsel %vm1613_vm15, %v1614_v62, %v1615_v43  ;;  %v1589_v52 = vrot.slane %v1475_v3, 3  ;;  %1741 = vmatpush.msrb.mxu1 %v1730_v51 }
 0x19f   :  { %v1625_v4 = vadd.f32 %v1616_v1, %v1597_v56  ;;  %v1493_v6 = vpop.f32.mrf.mxu2  ;;  %1705 = vmatpush.msrb.mxu0 %v1678_v21  ;;  %v1728_v56 = vld [vmem:[%s3145_s7 + $0x50] sm:$0xff] }
 0x1a0   :  { %v1590_v7 = vsel %vm1585_vm14, %v1587_v47, %v1589_v52  ;;  %v1494_v8 = vadd.f32 %v1493_v6, %v2974_v13  ;;  %v1512_v9 = vpop.f32.mrf.mxu3  ;;  %1742 = vmatpush.msrb.mxu1 %v1729_v54  ;;  %v1722_v6 = vld [vmem:[%s3145_s7 + $0x20] sm:$0xff] }
 0x1a1   :  { %v1598_v11 = vadd.f32 %v1590_v7, %v2988_v19  ;;  %v1457_v17 = vpop.f32.mrf.mxu0  ;;  %v1645_v22 = vsel %vm1643_vm0, %v1625_v4, -inf  ;;  %v1677_v19 = vld [vmem:[%s3143_s5 + $0x30] sm:$0xff] }
 0x1a2   :  { %v1513_v12 = vadd.f32 %v1512_v9, %v1494_v8  ;;  %v1458_v49 = vadd.f32 %v1457_v17, %v2968_v58  ;;  %v1476_v13 = vpop.f32.mrf.mxu1  ;;  %1706 = vmatpush.msrb.mxu0 %v1677_v19  ;;  %1743 = vmatpush.msrb.mxu1 %v1728_v56  ;;  %v2662_v8 = vld [vmem:[%s3142_s4] ss:$0 sm:$0xff]  ;;  %v1721_v9 = vld [vmem:[%s3145_s7 + $0x18] sm:$0xff]  ;;  %v1720_v17 = vld [vmem:[%s3145_s7 + $0x10] sm:$0xff] }
 0x1a3   :  { %v1719_v19 = vld [vmem:[%s3145_s7 + $0x8] sm:$0xff] }
 0x1a4   :  { %v1617_v10 = vrot.slane %v1513_v12, 4  ;;  %v1477_v28 = vadd.f32 %v1476_v13, %v1458_v49  ;;  %1707 = vmatpush.msrb.mxu0 %v1676_v15  ;;  %1744 = vmatpush.msrb.mxu1 %v1727_v59 }
 0x1a6   :  { %v1618_v37 = vsel %vm1613_vm15, %v1615_v43, %v1617_v10  ;;  %v1591_v30 = vrot.slane %v1477_v28, 3  ;;  %1708 = vmatpush.msrb.mxu0 %v1675_v33  ;;  %v1725_v43 = vld [vmem:[%s3145_s7 + $0x38] sm:$0xff]  ;;  %1745 = vmatpush.msrb.mxu1 %v1726_v63  ;;  %v2663_v28 = vld [vmem:[%s3144_s6] ss:$0 sm:$0xff] }
 0x1a7   :  { %v1626_v58 = vadd.f32 %v1618_v37, %v1598_v11  ;;  %v1495_v24 = vpop.f32.mrf.mxu2 }
 0x1a8   :  { %v1592_v36 = vsel %vm1585_vm14, %v1589_v52, %v1591_v30  ;;  %v1600_v0 = vadd.f32 %v1591_v30, %v1580_v32  ;;  %v1496_v38 = vadd.f32 %v1495_v24, %v2976_v26  ;;  %v1514_v40 = vpop.f32.mrf.mxu3  ;;  %1709 = vmatpush.msrb.mxu0 %v1674_v41  ;;  %1746 = vmatpush.msrb.mxu1 %v1725_v43  ;;  %v1723_v52 = vld [vmem:[%s3145_s7 + $0x28] sm:$0xff] }
 0x1a9   :  { %v1599_v29 = vadd.f32 %v1592_v36, %v2994_v35  ;;  %v1646_v55 = vsel %vm1644_vm1, %v1626_v58, -inf  ;;  %v1672_v35 = vld [vmem:[%s3143_s5 + $0x8] sm:$0xff]  ;;  %v2664_v58 = vld [vmem:[#allocation3] ss:$0 sm:$0xff] }
 0x1aa   :  { %1604 = vst [vmem:[#allocation2 + $0x8] sm:$0x1f] %v1600_v0  ;;  %v1515_v25 = vadd.f32 %v1514_v40, %v1496_v38  ;;  %v1649_v2 = vmax.f32 %v1645_v22, %v1646_v55  ;;  %1710 = vmatpush.msrb.mxu0 %v1673_v16  ;;  %1747 = vmatpush.msrb.mxu1 %v1724_v23 }
 0x1ac   :  { %v1619_v26 = vrot.slane %v1515_v25, 4  ;;  %1711 = vmatpush.msrb.mxu0 %v1672_v35  ;;  %v1650_v61 = vrot.slane %v1649_v2, 4  ;;  %1748 = vmatpush.msrb.mxu1 %v1723_v52 }
 0x1ae   :  { %v1620_v42 = vsel %vm1613_vm15, %v1617_v10, %v1619_v26  ;;  %1712 = vmatpush.msrb.mxu0 %v1671_v34  ;;  %v1651_v53 = vmax.f32 %v1649_v2, %v1650_v61  ;;  %1749 = vmatpush.msrb.mxu1 %v1722_v6  ;;  %v1718_v10 = vld [vmem:[%s3145_s7] sm:$0xff] }
 0x1af   :  { %v1627_v44 = vadd.f32 %v1620_v42, %v1599_v29 }
 0x1b0   :  { %v1652_v39 = vrot.slane %v1651_v53, 2  ;;  %1750 = vmatpush.msrb.mxu1 %v1721_v9 }
 0x1b1   :  { %v1608_v46 = vld [vmem:[#allocation2 + $0x8] sm:$0xf]  ;;  %v1647_v45 = vsel %vm1643_vm0, %v1627_v44, -inf }
 0x1b2   :  { %v1628_v47 = vadd.f32 %v1619_v26, %v1608_v46  ;;  %v1653_v5 = vmax.f32 %v1651_v53, %v1652_v39  ;;  %1751 = vmatpush.msrb.mxu1 %v1720_v17 }
 0x1b4   :  { %1632 = vst [vmem:[#allocation2 + $0x8] sm:$0xf] %v1628_v47  ;;  %v1654_v18 = vrot.slane %v1653_v5, 1  ;;  %1752 = vmatpush.msrb.mxu1 %v1719_v19 }
 0x1b6   :  { %v1655_v31 = vmax.f32 %v1653_v5, %v1654_v18  ;;  %1753 = vmatpush.msrb.mxu1 %v1718_v10 }
 0x1b8   :  { %v1667_v21 = vadd.f32 %v2662_v8, %v1655_v31 }
 0x1ba   :  { %v1669_v12 = vmax.f32 %v1667_v21, 0.0 }
 0x1bb   :  { %v1636_v27 = vld [vmem:[#allocation2 + $0x8] sm:$0xff] }
 0x1bc   :  { %v1648_v57 = vsel %vm1644_vm1, %v1636_v27, -inf }
 0x1bd   :  { %v1656_v60 = vmax.f32 %v1647_v45, %v1648_v57 }
 0x1bf   :  { %v1657_v62 = vrot.slane %v1656_v60, 4 }
 0x1c1   :  { %v1658_v3 = vmax.f32 %v1656_v60, %v1657_v62 }
 0x1c3   :  { %v1659_v1 = vrot.slane %v1658_v3, 2 }
 0x1c5   :  { %v1660_v4 = vmax.f32 %v1658_v3, %v1659_v1 }
 0x1c7   :  { %v1661_v7 = vrot.slane %v1660_v4, 1 }
 0x1c9   :  { %v1662_v11 = vmax.f32 %v1660_v4, %v1661_v7 }
 0x1cb   :  { %v1668_v22 = vadd.f32 %v2662_v8, %v1662_v11 }
 0x1cd   :  { %v1670_v14 = vmax.f32 %v1668_v22, 0.0 }
 0x1cf   :  { %v1693_v49 = vrot.slane %v1670_v14, 7 }
 0x1d1   :  { %v1695_v13 = vsel %vm1694_vm2, %v1693_v49, %v1669_v12 }
 0x1d2   :  { %1713 = vmatmul.f32.vlgmr.msrb.gmra.mxu0 %v1695_v13 }
 0x24f   :  { %v1714_v15 = vpop.f32.mrf.mxu0 }
 0x250   :  { %v1715_v37 = vadd.f32 %v2663_v28, %v1714_v15 }
 0x252   :  { %v1717_v30 = vmax.f32 %v1715_v37, 0.0 }
 0x254   :  { %1754 = vmatmul.f32.vlgmr.msrb.gmra.mxu1 %v1717_v30 }
 0x2d1   :  { %v1755_v32 = vpop.f32.mrf.mxu1 }
 0x2d2   :  { %v1756_v24 = vadd.f32 %v2664_v58, %v1755_v32 }
 0x2d4   :  { %1759 = vst.msk [vmem:[%s3147_s9] sm:$0x3] %vm1758_vm3, %v1756_v24 }
 0x2d5   :  { %1764 = vsyncpa [#allocation5], 1 }
 0x2d6   :  { %1765 = vsyncpa [#allocation7], 1 }

</bundles_post_ra>
